<compile_context>
chip_gen: v5e
topology: v5e:2x2
jax: 0.10.0
libtpu: 0.0.40
codegen_flags: <defaults>
</compile_context>

<pallas_src>
import functools

import jax
import jax.numpy as jnp
import numpy as np
from jax.experimental import pallas as pl
from jax.experimental.pallas import tpu as pltpu

# ----------------------------- model configuration (small) -----------------------------
NUM_CLASSES = 5
FEAT_CHANNELS = [8, 8, 16, 24, 32]          # stub backbone feat_channels
BACKBONE_STRIDES = [1, 2, 4, 8, 16]         # stub backbone output strides
BACKBONE_INDICES = [2, 3, 4]
ARM_OUT_CHS = [16, 24, 32]
CM_BIN_SIZES = [1, 2, 4]
CM_OUT_CH = 32
SEG_HEAD_INTER_CHS = [16, 16, 16]
BN_EPS = 1e-5

_MIN_PALLAS_M = 512   # below this many pixels a pallas_call launch costs more than it saves
_TILES = (4096, 2048, 1024, 512, 256, 128)


def _pick_tile(m):
    """Largest lane tile (multiple of 128) dividing m with >=2 grid steps (keeps both v7x
    TensorCores busy while adding only ~0.35us of step overhead on v5e/v6e); None -> XLA."""
    if m < _MIN_PALLAS_M:
        return None
    for tm in _TILES:
        if m % tm == 0 and m // tm >= 2:
            return tm
    return None


# ------------------------------------ Pallas kernels ------------------------------------
# All kernels compute channel-major: W[cout, K] @ A[K, TM] -> (cout, TM), lane dim = TM.
def _conv_kernel(a_ref, w_ref, s_ref, b_ref, o_ref, *, act):
    """o = act((w @ a) * scale + bias); bf16 matmul operands, f32 accumulate + epilogue."""
    acc = jnp.dot(w_ref[...], a_ref[...], preferred_element_type=jnp.float32)
    out = acc * s_ref[...] + b_ref[...]
    if act == "relu":
        out = jnp.maximum(out, 0.0)
    o_ref[...] = out.astype(o_ref.dtype)


def _convx_stats_kernel(a_ref, w_ref, s_ref, b_ref, y_ref, x_ref, am_ref):
    """UAFM prepare_x + stats: x = relu(BN(w@a)); am = [mean(x); max(x); mean(y); max(y)]."""
    acc = jnp.dot(w_ref[...], a_ref[...], preferred_element_type=jnp.float32)
    x = jnp.maximum(acc * s_ref[...] + b_ref[...], 0.0)          # (c, tm) f32
    y = y_ref[...].astype(jnp.float32)                           # (c, tm)
    x_ref[...] = x.astype(x_ref.dtype)
    stats = jnp.concatenate(
        [jnp.mean(x, axis=0, keepdims=True), jnp.max(x, axis=0, keepdims=True),
         jnp.mean(y, axis=0, keepdims=True), jnp.max(y, axis=0, keepdims=True)], axis=0)
    am_ref[...] = stats.astype(am_ref.dtype)                     # single lane-dense store


def _atten_blend_kernel(a_ref, w_ref, s_ref, b_ref, x_ref, y_ref, o_ref):
    """UAFM atten1 + blend: att = sigmoid(BN(atten1(a))); o = x*att + y*(1-att).
    atten1 has one output channel -> VPU multiply + sublane reduce instead of an MXU pass."""
    logit = jnp.sum(a_ref[...].astype(jnp.float32) * w_ref[...], axis=0, keepdims=True)
    att = jax.nn.sigmoid(logit * s_ref[...] + b_ref[...])        # (1, tm)
    x = x_ref[...].astype(jnp.float32)
    y = y_ref[...].astype(jnp.float32)
    o_ref[...] = (x * att + y * (1.0 - att)).astype(o_ref.dtype)


def _head_kernel(a_ref, w1_ref, s_ref, b_ref, w2_ref, o_ref):
    """SegHead: relu(BN(w1@a)) chained into the 1x1 classifier matmul (no HBM round trip)."""
    h = jnp.dot(w1_ref[...], a_ref[...], preferred_element_type=jnp.float32)
    h = jnp.maximum(h * s_ref[...] + b_ref[...], 0.0)
    o_ref[...] = jnp.dot(w2_ref[...], h.astype(jnp.bfloat16),
                         preferred_element_type=jnp.float32)


# ------------------------------------ Pallas wrappers ------------------------------------
_PARAMS = pltpu.CompilerParams(dimension_semantics=("parallel",))


def _col_spec(rows, tm):
    """Block of TM lane-contiguous pixel columns (rows = full channel / K extent)."""
    return pl.BlockSpec((rows, tm), lambda i: (0, i))


def _rep_spec(shape):
    """Whole small array, reused by every grid step (weights, folded-BN scale/bias)."""
    return pl.BlockSpec(shape, lambda i: (0, 0))


def conv_pallas(a, w, scale, bias, act, tm, out_dtype=jnp.bfloat16):
    k, m = a.shape
    cout = w.shape[0]
    return pl.pallas_call(
        functools.partial(_conv_kernel, act=act),
        out_shape=jax.ShapeDtypeStruct((cout, m), out_dtype),
        grid=(m // tm,),
        in_specs=[_col_spec(k, tm), _rep_spec((cout, k)),
                  _rep_spec((cout, 1)), _rep_spec((cout, 1))],
        out_specs=_col_spec(cout, tm),
        compiler_params=_PARAMS,
    )(a, w, scale, bias)


def convx_stats_pallas(a, p, y2, tm):
    k, m = a.shape
    c = p["w"].shape[0]
    return pl.pallas_call(
        _convx_stats_kernel,
        out_shape=(jax.ShapeDtypeStruct((c, m), jnp.bfloat16),
                   jax.ShapeDtypeStruct((4, m), jnp.bfloat16)),
        grid=(m // tm,),
        in_specs=[_col_spec(k, tm), _rep_spec((c, k)), _rep_spec((c, 1)),
                  _rep_spec((c, 1)), _col_spec(c, tm)],
        out_specs=[_col_spec(c, tm), _col_spec(4, tm)],
        compiler_params=_PARAMS,
    )(a, p["w"], p["scale"], p["bias"], y2)


def atten_blend_pallas(a, p, x2, y2, tm):
    k, m = a.shape
    c = x2.shape[0]
    w_col = p["w"].astype(jnp.float32).T          # (k, 1): VPU path for the 1-channel conv
    return pl.pallas_call(
        _atten_blend_kernel,
        out_shape=jax.ShapeDtypeStruct((c, m), jnp.bfloat16),
        grid=(m // tm,),
        in_specs=[_col_spec(k, tm), _rep_spec((k, 1)), _rep_spec((1, 1)),
                  _rep_spec((1, 1)), _col_spec(c, tm), _col_spec(c, tm)],
        out_specs=_col_spec(c, tm),
        compiler_params=_PARAMS,
    )(a, w_col, p["scale"], p["bias"], x2, y2)


def conv_head_pallas(a, p_conv, w2, tm):
    k, m = a.shape
    cmid = p_conv["w"].shape[0]
    ncls = w2.shape[0]
    return pl.pallas_call(
        _head_kernel,
        out_shape=jax.ShapeDtypeStruct((ncls, m), jnp.float32),   # final logits stay f32
        grid=(m // tm,),
        in_specs=[_col_spec(k, tm), _rep_spec((cmid, k)), _rep_spec((cmid, 1)),
                  _rep_spec((cmid, 1)), _rep_spec((ncls, cmid))],
        out_specs=_col_spec(ncls, tm),
        compiler_params=_PARAMS,
    )(a, p_conv["w"], p_conv["scale"], p_conv["bias"], w2)


# --------------------------------------- JAX glue ---------------------------------------
def _im2col_cm(x, k):
    """Channel-major im2col: (C, N, H, W) -> (k*k*C, N*H*W), K ordered (kh, kw, cin)."""
    c, n, h, w = x.shape
    if k == 1:
        return x.reshape(c, n * h * w)
    pad = k // 2
    xp = jnp.pad(x, ((0, 0), (0, 0), (pad, pad), (pad, pad)))
    taps = [xp[:, :, kh:kh + h, kw:kw + w] for kh in range(k) for kw in range(k)]
    return jnp.concatenate(taps, axis=0).reshape(k * k * c, n * h * w)


def _conv_cols_jax(a, p, act):
    """Plain-XLA fallback for tiny pixel counts (same bf16-operand / f32-epilogue numerics)."""
    out = jnp.dot(p["w"], a, preferred_element_type=jnp.float32)
    out = out * p["scale"] + p["bias"]
    if act == "relu":
        out = jnp.maximum(out, 0.0)
    return out


def conv_bn_act(x, p, act):
    """ConvBN(ReLU), stride 1, 'same' padding, channel-major. Pallas for big maps, XLA else."""
    c, n, h, w = x.shape
    cout, kk = p["w"].shape
    ksize = int(round((kk // c) ** 0.5))
    a = _im2col_cm(x, ksize).astype(jnp.bfloat16)
    tm = _pick_tile(n * h * w)
    if tm is None:
        out = _conv_cols_jax(a, p, act)
    else:
        out = conv_pallas(a, p["w"], p["scale"], p["bias"], act, tm)
    return out.reshape(cout, n, h, w)


def avg_pool_hw(x, f):
    if f == 1:
        return x
    c, n, h, w = x.shape
    return x.reshape(c, n, h // f, f, w // f, f).mean(axis=(3, 5))


def adaptive_avg_pool_hw(x, out_h, out_w):
    """Exact PyTorch AdaptiveAvgPool2d window semantics on the trailing (H, W) dims."""
    h, w = x.shape[-2], x.shape[-1]
    rows = []
    for i in range(out_h):
        h0, h1 = (i * h) // out_h, -((-(i + 1) * h) // out_h)
        cols = []
        for j in range(out_w):
            w0, w1 = (j * w) // out_w, -((-(j + 1) * w) // out_w)
            cols.append(jnp.mean(x[..., h0:h1, w0:w1], axis=(-2, -1)))
        rows.append(jnp.stack(cols, axis=-1))
    return jnp.stack(rows, axis=-2)


def _linear_resize_idx(in_size, out_size, align_corners):
    if align_corners:
        scale = (in_size - 1) / (out_size - 1) if out_size > 1 else 0.0
        src = jnp.arange(out_size, dtype=jnp.float32) * scale
    else:
        scale = in_size / out_size
        src = jnp.maximum((jnp.arange(out_size, dtype=jnp.float32) + 0.5) * scale - 0.5, 0.0)
    i0 = jnp.clip(jnp.floor(src).astype(jnp.int32), 0, in_size - 1)
    i1 = jnp.minimum(i0 + 1, in_size - 1)
    w1 = src - i0.astype(jnp.float32)
    return i0, i1, 1.0 - w1, w1


def bilinear_resize_hw(x, out_h, out_w, align_corners=False):
    """torch F.interpolate(mode='bilinear') on the trailing (H, W) dims of any 4-D layout."""
    h, w = x.shape[-2], x.shape[-1]
    if h == out_h and w == out_w:
        return x
    h0, h1, wh0, wh1 = _linear_resize_idx(h, out_h, align_corners)
    w0, w1, ww0, ww1 = _linear_resize_idx(w, out_w, align_corners)
    xh = x[..., h0, :] * wh0[:, None] + x[..., h1, :] * wh1[:, None]
    return xh[..., :, w0] * ww0 + xh[..., :, w1] * ww1


# ------------------------------------- parameters ---------------------------------------
def make_conv_params(key, cin, cout, ksize, with_bn=True):
    k1, k2, k3, k4, k5 = jax.random.split(key, 5)
    w = jax.random.normal(k1, (cout, cin, ksize, ksize), jnp.float32) / np.sqrt(cin * ksize * ksize)
    # (cout, K) with K ordered (kh, kw, cin) to match _im2col_cm's tap concatenation order.
    w_mat = jnp.transpose(w, (0, 2, 3, 1)).reshape(cout, ksize * ksize * cin)
    if with_bn:
        gamma = jax.random.uniform(k2, (cout,), minval=0.5, maxval=1.5)
        beta = jax.random.normal(k3, (cout,)) * 0.1
        running_mean = jax.random.normal(k4, (cout,)) * 0.1
        running_var = jax.random.uniform(k5, (cout,), minval=0.5, maxval=1.5)
        scale = gamma / jnp.sqrt(running_var + BN_EPS)
        bias = beta - running_mean * scale
    else:
        scale = jnp.ones((cout,), jnp.float32)
        bias = jnp.zeros((cout,), jnp.float32)
    return {"w": w_mat.astype(jnp.bfloat16),                      # bf16 MXU operands
            "scale": scale.reshape(cout, 1).astype(jnp.float32),  # f32 epilogue (folded BN)
            "bias": bias.reshape(cout, 1).astype(jnp.float32)}


def init_params(key):
    keys = iter(jax.random.split(key, 64))
    params = {}
    # Stub backbone: 3 -> feat_channels[i], 3x3 ConvBNReLU after avg-pool downsample.
    # Only the selected indices are instantiated / computed (others are never consumed).
    params["backbone"] = {i: make_conv_params(next(keys), 3, FEAT_CHANNELS[i], 3)
                          for i in BACKBONE_INDICES}
    bo = [FEAT_CHANNELS[i] for i in BACKBONE_INDICES]
    # PPContextModule
    params["cm"] = {
        "stages": [make_conv_params(next(keys), bo[-1], CM_OUT_CH, 1) for _ in CM_BIN_SIZES],
        "conv_out": make_conv_params(next(keys), CM_OUT_CH, CM_OUT_CH, 3),
    }
    # UAFM_SpAtten modules
    arms = []
    for i in range(len(bo)):
        high_ch = CM_OUT_CH if i == len(bo) - 1 else ARM_OUT_CHS[i + 1]
        arms.append({
            "conv_x": make_conv_params(next(keys), bo[i], high_ch, 3),
            "conv_out": make_conv_params(next(keys), high_ch, ARM_OUT_CHS[i], 3),
            "atten0": make_conv_params(next(keys), 4, 2, 3),   # ConvBNReLU(4 -> 2, 3x3)
            "atten1": make_conv_params(next(keys), 2, 1, 3),   # ConvBN(2 -> 1, 3x3)
        })
    params["arms"] = arms
    # SegHeads (all three built; eval() forward only uses index 0). Classifier has bias=False.
    heads = []
    for in_ch, mid_ch in zip(ARM_OUT_CHS, SEG_HEAD_INTER_CHS):
        heads.append({
            "conv": make_conv_params(next(keys), in_ch, mid_ch, 3),
            "conv_out": make_conv_params(next(keys), mid_ch, NUM_CLASSES, 1, with_bn=False),
        })
    params["seg_heads"] = heads
    return params


# ------------------------------------- model blocks -------------------------------------
def pp_context_module(p, inp):
    _, n, h, w = inp.shape
    out = None
    for sp, size in zip(p["stages"], CM_BIN_SIZES):
        z = adaptive_avg_pool_hw(inp, size, size)
        z = conv_bn_act(z, sp, act="relu")                 # tiny maps -> XLA path
        z = bilinear_resize_hw(z, h, w, align_corners=False)
        out = z if out is None else out + z
    return conv_bn_act(out, p["conv_out"], act="relu")


def uafm_spatten(p, x_low, y_high):
    _, n, h, w = x_low.shape
    c = p["conv_x"]["w"].shape[0]                                  # high_ch
    m = n * h * w
    y = bilinear_resize_hw(y_high, h, w, align_corners=False)      # prepare_y
    y2 = y.reshape(c, m).astype(jnp.float32)
    a_x = _im2col_cm(x_low, 3).astype(jnp.bfloat16)
    tm = _pick_tile(m)
    if tm is None:
        # Tiny map: plain XLA (a pallas_call launch would dominate here).
        x2 = _conv_cols_jax(a_x, p["conv_x"], "relu")               # prepare_x
        am = jnp.concatenate(
            [jnp.mean(x2, axis=0, keepdims=True), jnp.max(x2, axis=0, keepdims=True),
             jnp.mean(y2, axis=0, keepdims=True), jnp.max(y2, axis=0, keepdims=True)], axis=0)
        att = _conv_cols_jax(_im2col_cm(am.reshape(4, n, h, w), 3).astype(jnp.bfloat16),
                             p["atten0"], "relu")
        logit = _conv_cols_jax(_im2col_cm(att.reshape(2, n, h, w), 3).astype(jnp.bfloat16),
                               p["atten1"], None)
        sig = jax.nn.sigmoid(logit)
        out2 = x2 * sig + y2 * (1.0 - sig)
    else:
        # Fused: conv_x + channel avg/max stats in one kernel; atten1 + sigmoid blend in one.
        x2, am = convx_stats_pallas(a_x, p["conv_x"], y2, tm)
        att = conv_bn_act(am.reshape(4, n, h, w), p["atten0"], "relu")
        a_att = _im2col_cm(att, 3).astype(jnp.bfloat16)
        out2 = atten_blend_pallas(a_att, p["atten1"], x2, y2, tm)
    out = out2.reshape(c, n, h, w)
    return conv_bn_act(out, p["conv_out"], act="relu")


def seg_head(p, x):
    _, n, h, w = x.shape
    m = n * h * w
    ncls = p["conv_out"]["w"].shape[0]
    a = _im2col_cm(x, 3).astype(jnp.bfloat16)
    tm = _pick_tile(m)
    if tm is None:
        hid = _conv_cols_jax(a, p["conv"], "relu")
        out = jnp.dot(p["conv_out"]["w"], hid.astype(jnp.bfloat16),
                      preferred_element_type=jnp.float32)
    else:
        # 3x3 ConvBNReLU + 1x1 classifier fused in one kernel; output is (ncls, M) lane-dense.
        out = conv_head_pallas(a, p["conv"], p["conv_out"]["w"], tm)
    return out.reshape(ncls, n, h, w)


def ppliteseg_forward(params, x_nchw):
    x = jnp.transpose(x_nchw, (1, 0, 2, 3)).astype(jnp.float32)    # NCHW -> CNHW (channel-major)
    x_hw = x.shape[2:4]

    # stub backbone, computed only at the selected indices (feats[0]/feats[1] never consumed)
    feats_sel = []
    for i in BACKBONE_INDICES:
        xd = avg_pool_hw(x, BACKBONE_STRIDES[i])
        feats_sel.append(conv_bn_act(xd, params["backbone"][i], act="relu"))

    # PPLiteSegHead: context module + cascaded UAFM_SpAtten (deep -> shallow)
    high = pp_context_module(params["cm"], feats_sel[-1])
    out_feats = [None] * len(feats_sel)
    for i in reversed(range(len(feats_sel))):
        high = uafm_spatten(params["arms"][i], feats_sel[i], high)
        out_feats[i] = high

    # eval() branch: only seg_heads[0] on feats_head[0], then upsample to input size
    y = seg_head(params["seg_heads"][0], out_feats[0])             # (ncls, N, H/4, W/4) f32
    y = jnp.transpose(y, (1, 0, 2, 3))                             # tiny swap at low res -> NCHW
    y = bilinear_resize_hw(y, x_hw[0], x_hw[1], align_corners=False)
    return [y]


# ------------------------------------------ main ------------------------------------------
if __name__ == "__main__":
    root = jax.random.PRNGKey(0)
    k_params, k_input = jax.random.split(root)
    params = init_params(k_params)
    x = jax.random.normal(k_input, (2, 3, 64, 64), jnp.float32)    # NCHW, like PyTorch

    forward = jax.jit(ppliteseg_forward)
    logit_list = forward(params, x)
    logit = jax.block_until_ready(logit_list[0])

    assert logit.shape == (2, NUM_CLASSES, 64, 64), logit.shape
    assert bool(jnp.all(jnp.isfinite(logit)))
    print("KERNEL_OK")
</pallas_src>

<mosaic_0001>
module attributes {stable_mosaic.version = 11 : i64} {
  func.func @_conv_kernel(%arg0: i32, %arg1: memref<27x256xbf16, #tpu.memory_space<vmem>>, %arg2: memref<16x27xbf16, #tpu.memory_space<vmem>>, %arg3: memref<16x1xf32, #tpu.memory_space<vmem>>, %arg4: memref<16x1xf32, #tpu.memory_space<vmem>>, %arg5: memref<16x256xbf16, #tpu.memory_space<vmem>>) attributes {dimension_semantics = [#tpu.dimension_semantics<parallel>], iteration_bounds = array<i64: 2>, scalar_prefetch = 0 : i64, scratch_operands = 0 : i64, tpu.core_type = #tpu.core_type<tc>, window_params = [{transform_indices = @transform_0, window_bounds = array<i64: 27, 256>}, {pipeline_mode = #tpu.pipeline_mode<synchronous>, transform_indices = @transform_1, window_bounds = array<i64: 16, 27>}, {pipeline_mode = #tpu.pipeline_mode<synchronous>, transform_indices = @transform_2, window_bounds = array<i64: 16, 1>}, {pipeline_mode = #tpu.pipeline_mode<synchronous>, transform_indices = @transform_3, window_bounds = array<i64: 16, 1>}, {transform_indices = @transform_4, window_bounds = array<i64: 16, 256>}]} {
    %c0 = arith.constant 0 : index
    %c0_0 = arith.constant 0 : index
    %0 = vector.load %arg2[%c0, %c0_0] : memref<16x27xbf16, #tpu.memory_space<vmem>>, vector<16x27xbf16>
    %c0_1 = arith.constant 0 : index
    %c0_2 = arith.constant 0 : index
    %1 = vector.load %arg1[%c0_1, %c0_2] : memref<27x256xbf16, #tpu.memory_space<vmem>>, vector<27x256xbf16>
    %cst = arith.constant dense<0.000000e+00> : vector<16x256xf32>
    %2 = tpu.matmul %0, %1, %cst {dimension_numbers = #tpu.dot_dimension_numbers<[1], [0], [0], [1], [0, 0, 1, 1], [], []>} : vector<16x27xbf16>, vector<27x256xbf16>, vector<16x256xf32> -> vector<16x256xf32>
    %c0_3 = arith.constant 0 : index
    %c0_4 = arith.constant 0 : index
    %3 = vector.load %arg3[%c0_3, %c0_4] : memref<16x1xf32, #tpu.memory_space<vmem>>, vector<16x1xf32>
    %4 = vector.broadcast %3 : vector<16x1xf32> to vector<16x256xf32>
    %5 = arith.mulf %2, %4 : vector<16x256xf32>
    %c0_5 = arith.constant 0 : index
    %c0_6 = arith.constant 0 : index
    %6 = vector.load %arg4[%c0_5, %c0_6] : memref<16x1xf32, #tpu.memory_space<vmem>>, vector<16x1xf32>
    %7 = vector.broadcast %6 : vector<16x1xf32> to vector<16x256xf32>
    %8 = arith.addf %5, %7 : vector<16x256xf32>
    %cst_7 = arith.constant 0.000000e+00 : f32
    %9 = vector.broadcast %cst_7 : f32 to vector<16x256xf32>
    %10 = arith.maximumf %8, %9 : vector<16x256xf32>
    %11 = arith.truncf %10 : vector<16x256xf32> to vector<16x256xbf16>
    %c0_8 = arith.constant 0 : index
    %c0_9 = arith.constant 0 : index
    %12 = vector.load %arg5[%c0_8, %c0_9] : memref<16x256xbf16, #tpu.memory_space<vmem>>, vector<16x256xbf16>
    tpu.vector_store %arg5[%c0_8, %c0_9], %11 {strides = array<i32>} : memref<16x256xbf16, #tpu.memory_space<vmem>>, vector<16x256xbf16>,
    return
  }
  func.func @transform_0(%arg0: i32) -> (i32, i32) {
    %c0_i32 = arith.constant 0 : i32
    %c0_i32_0 = arith.constant 0 : i32
    return %c0_i32, %arg0 : i32, i32
  }
  func.func @transform_1(%arg0: i32) -> (i32, i32) {
    %c0_i32 = arith.constant 0 : i32
    %c0_i32_0 = arith.constant 0 : i32
    %c0_i32_1 = arith.constant 0 : i32
    return %c0_i32, %c0_i32_0 : i32, i32
  }
  func.func @transform_2(%arg0: i32) -> (i32, i32) {
    %c0_i32 = arith.constant 0 : i32
    %c0_i32_0 = arith.constant 0 : i32
    %c0_i32_1 = arith.constant 0 : i32
    return %c0_i32, %c0_i32_0 : i32, i32
  }
  func.func @transform_3(%arg0: i32) -> (i32, i32) {
    %c0_i32 = arith.constant 0 : i32
    %c0_i32_0 = arith.constant 0 : i32
    %c0_i32_1 = arith.constant 0 : i32
    return %c0_i32, %c0_i32_0 : i32, i32
  }
  func.func @transform_4(%arg0: i32) -> (i32, i32) {
    %c0_i32 = arith.constant 0 : i32
    %c0_i32_0 = arith.constant 0 : i32
    return %c0_i32, %arg0 : i32, i32
  }
}

module attributes {stable_mosaic.version = 11 : i64} {
  func.func @_convx_stats_kernel(%arg0: i32, %arg1: memref<144x256xbf16, #tpu.memory_space<vmem>>, %arg2: memref<24x144xbf16, #tpu.memory_space<vmem>>, %arg3: memref<24x1xf32, #tpu.memory_space<vmem>>, %arg4: memref<24x1xf32, #tpu.memory_space<vmem>>, %arg5: memref<24x256xf32, #tpu.memory_space<vmem>>, %arg6: memref<24x256xbf16, #tpu.memory_space<vmem>>, %arg7: memref<4x256xbf16, #tpu.memory_space<vmem>>) attributes {dimension_semantics = [#tpu.dimension_semantics<parallel>], iteration_bounds = array<i64: 2>, scalar_prefetch = 0 : i64, scratch_operands = 0 : i64, tpu.core_type = #tpu.core_type<tc>, window_params = [{transform_indices = @transform_0, window_bounds = array<i64: 144, 256>}, {pipeline_mode = #tpu.pipeline_mode<synchronous>, transform_indices = @transform_1, window_bounds = array<i64: 24, 144>}, {pipeline_mode = #tpu.pipeline_mode<synchronous>, transform_indices = @transform_2, window_bounds = array<i64: 24, 1>}, {pipeline_mode = #tpu.pipeline_mode<synchronous>, transform_indices = @transform_3, window_bounds = array<i64: 24, 1>}, {transform_indices = @transform_4, window_bounds = array<i64: 24, 256>}, {transform_indices = @transform_5, window_bounds = array<i64: 24, 256>}, {transform_indices = @transform_6, window_bounds = array<i64: 4, 256>}]} {
    %c0 = arith.constant 0 : index
    %c0_0 = arith.constant 0 : index
    %0 = vector.load %arg2[%c0, %c0_0] : memref<24x144xbf16, #tpu.memory_space<vmem>>, vector<24x144xbf16>
    %c0_1 = arith.constant 0 : index
    %c0_2 = arith.constant 0 : index
    %1 = vector.load %arg1[%c0_1, %c0_2] : memref<144x256xbf16, #tpu.memory_space<vmem>>, vector<144x256xbf16>
    %cst = arith.constant dense<0.000000e+00> : vector<24x256xf32>
    %2 = tpu.matmul %0, %1, %cst {dimension_numbers = #tpu.dot_dimension_numbers<[1], [0], [0], [1], [0, 0, 1, 1], [], []>} : vector<24x144xbf16>, vector<144x256xbf16>, vector<24x256xf32> -> vector<24x256xf32>
    %c0_3 = arith.constant 0 : index
    %c0_4 = arith.constant 0 : index
    %3 = vector.load %arg3[%c0_3, %c0_4] : memref<24x1xf32, #tpu.memory_space<vmem>>, vector<24x1xf32>
    %4 = vector.broadcast %3 : vector<24x1xf32> to vector<24x256xf32>
    %5 = arith.mulf %2, %4 : vector<24x256xf32>
    %c0_5 = arith.constant 0 : index
    %c0_6 = arith.constant 0 : index
    %6 = vector.load %arg4[%c0_5, %c0_6] : memref<24x1xf32, #tpu.memory_space<vmem>>, vector<24x1xf32>
    %7 = vector.broadcast %6 : vector<24x1xf32> to vector<24x256xf32>
    %8 = arith.addf %5, %7 : vector<24x256xf32>
    %cst_7 = arith.constant 0.000000e+00 : f32
    %9 = vector.broadcast %cst_7 : f32 to vector<24x256xf32>
    %10 = arith.maximumf %8, %9 : vector<24x256xf32>
    %c0_8 = arith.constant 0 : index
    %c0_9 = arith.constant 0 : index
    %11 = vector.load %arg5[%c0_8, %c0_9] : memref<24x256xf32, #tpu.memory_space<vmem>>, vector<24x256xf32>
    %12 = arith.truncf %10 : vector<24x256xf32> to vector<24x256xbf16>
    %c0_10 = arith.constant 0 : index
    %c0_11 = arith.constant 0 : index
    %13 = vector.load %arg6[%c0_10, %c0_11] : memref<24x256xbf16, #tpu.memory_space<vmem>>, vector<24x256xbf16>
    tpu.vector_store %arg6[%c0_10, %c0_11], %12 {strides = array<i32>} : memref<24x256xbf16, #tpu.memory_space<vmem>>, vector<24x256xbf16>,
    %cst_12 = arith.constant dense<0.000000e+00> : vector<256xf32>
    %14 = vector.multi_reduction <add>, %10, %cst_12 [0] : vector<24x256xf32> to vector<256xf32>
    %15 = vector.shape_cast %14 : vector<256xf32> to vector<1x256xf32>
    %cst_13 = arith.constant 2.400000e+01 : f32
    %16 = vector.broadcast %cst_13 : f32 to vector<1x256xf32>
    %17 = arith.divf %15, %16 : vector<1x256xf32>
    %cst_14 = arith.constant dense<0xFF800000> : vector<256xf32>
    %18 = vector.multi_reduction <maximumf>, %10, %cst_14 [0] : vector<24x256xf32> to vector<256xf32>
    %19 = vector.shape_cast %18 : vector<256xf32> to vector<1x256xf32>
    %cst_15 = arith.constant dense<0.000000e+00> : vector<256xf32>
    %20 = vector.multi_reduction <add>, %11, %cst_15 [0] : vector<24x256xf32> to vector<256xf32>
    %21 = vector.shape_cast %20 : vector<256xf32> to vector<1x256xf32>
    %cst_16 = arith.constant 2.400000e+01 : f32
    %22 = vector.broadcast %cst_16 : f32 to vector<1x256xf32>
    %23 = arith.divf %21, %22 : vector<1x256xf32>
    %cst_17 = arith.constant dense<0xFF800000> : vector<256xf32>
    %24 = vector.multi_reduction <maximumf>, %11, %cst_17 [0] : vector<24x256xf32> to vector<256xf32>
    %25 = vector.shape_cast %24 : vector<256xf32> to vector<1x256xf32>
    %26 = tpu.concatenate %17, %19, %23, %25 in 0 : vector<1x256xf32>, vector<1x256xf32>, vector<1x256xf32>, vector<1x256xf32> -> vector<4x256xf32>
    %27 = arith.truncf %26 : vector<4x256xf32> to vector<4x256xbf16>
    %c0_18 = arith.constant 0 : index
    %c0_19 = arith.constant 0 : index
    %28 = vector.load %arg7[%c0_18, %c0_19] : memref<4x256xbf16, #tpu.memory_space<vmem>>, vector<4x256xbf16>
    tpu.vector_store %arg7[%c0_18, %c0_19], %27 {strides = array<i32>} : memref<4x256xbf16, #tpu.memory_space<vmem>>, vector<4x256xbf16>,
    return
  }
  func.func @transform_0(%arg0: i32) -> (i32, i32) {
    %c0_i32 = arith.constant 0 : i32
    %c0_i32_0 = arith.constant 0 : i32
    return %c0_i32, %arg0 : i32, i32
  }
  func.func @transform_1(%arg0: i32) -> (i32, i32) {
    %c0_i32 = arith.constant 0 : i32
    %c0_i32_0 = arith.constant 0 : i32
    %c0_i32_1 = arith.constant 0 : i32
    return %c0_i32, %c0_i32_0 : i32, i32
  }
  func.func @transform_2(%arg0: i32) -> (i32, i32) {
    %c0_i32 = arith.constant 0 : i32
    %c0_i32_0 = arith.constant 0 : i32
    %c0_i32_1 = arith.constant 0 : i32
    return %c0_i32, %c0_i32_0 : i32, i32
  }
  func.func @transform_3(%arg0: i32) -> (i32, i32) {
    %c0_i32 = arith.constant 0 : i32
    %c0_i32_0 = arith.constant 0 : i32
    %c0_i32_1 = arith.constant 0 : i32
    return %c0_i32, %c0_i32_0 : i32, i32
  }
  func.func @transform_4(%arg0: i32) -> (i32, i32) {
    %c0_i32 = arith.constant 0 : i32
    %c0_i32_0 = arith.constant 0 : i32
    return %c0_i32, %arg0 : i32, i32
  }
  func.func @transform_5(%arg0: i32) -> (i32, i32) {
    %c0_i32 = arith.constant 0 : i32
    %c0_i32_0 = arith.constant 0 : i32
    return %c0_i32, %arg0 : i32, i32
  }
  func.func @transform_6(%arg0: i32) -> (i32, i32) {
    %c0_i32 = arith.constant 0 : i32
    %c0_i32_0 = arith.constant 0 : i32
    return %c0_i32, %arg0 : i32, i32
  }
}

module attributes {stable_mosaic.version = 11 : i64} {
  func.func @_conv_kernel(%arg0: i32, %arg1: memref<36x256xbf16, #tpu.memory_space<vmem>>, %arg2: memref<2x36xbf16, #tpu.memory_space<vmem>>, %arg3: memref<2x1xf32, #tpu.memory_space<vmem>>, %arg4: memref<2x1xf32, #tpu.memory_space<vmem>>, %arg5: memref<2x256xbf16, #tpu.memory_space<vmem>>) attributes {dimension_semantics = [#tpu.dimension_semantics<parallel>], iteration_bounds = array<i64: 2>, scalar_prefetch = 0 : i64, scratch_operands = 0 : i64, tpu.core_type = #tpu.core_type<tc>, window_params = [{transform_indices = @transform_0, window_bounds = array<i64: 36, 256>}, {pipeline_mode = #tpu.pipeline_mode<synchronous>, transform_indices = @transform_1, window_bounds = array<i64: 2, 36>}, {pipeline_mode = #tpu.pipeline_mode<synchronous>, transform_indices = @transform_2, window_bounds = array<i64: 2, 1>}, {pipeline_mode = #tpu.pipeline_mode<synchronous>, transform_indices = @transform_3, window_bounds = array<i64: 2, 1>}, {transform_indices = @transform_4, window_bounds = array<i64: 2, 256>}]} {
    %c0 = arith.constant 0 : index
    %c0_0 = arith.constant 0 : index
    %0 = vector.load %arg2[%c0, %c0_0] : memref<2x36xbf16, #tpu.memory_space<vmem>>, vector<2x36xbf16>
    %c0_1 = arith.constant 0 : index
    %c0_2 = arith.constant 0 : index
    %1 = vector.load %arg1[%c0_1, %c0_2] : memref<36x256xbf16, #tpu.memory_space<vmem>>, vector<36x256xbf16>
    %cst = arith.constant dense<0.000000e+00> : vector<2x256xf32>
    %2 = tpu.matmul %0, %1, %cst {dimension_numbers = #tpu.dot_dimension_numbers<[1], [0], [0], [1], [0, 0, 1, 1], [], []>} : vector<2x36xbf16>, vector<36x256xbf16>, vector<2x256xf32> -> vector<2x256xf32>
    %c0_3 = arith.constant 0 : index
    %c0_4 = arith.constant 0 : index
    %3 = vector.load %arg3[%c0_3, %c0_4] : memref<2x1xf32, #tpu.memory_space<vmem>>, vector<2x1xf32>
    %4 = vector.broadcast %3 : vector<2x1xf32> to vector<2x256xf32>
    %5 = arith.mulf %2, %4 : vector<2x256xf32>
    %c0_5 = arith.constant 0 : index
    %c0_6 = arith.constant 0 : index
    %6 = vector.load %arg4[%c0_5, %c0_6] : memref<2x1xf32, #tpu.memory_space<vmem>>, vector<2x1xf32>
    %7 = vector.broadcast %6 : vector<2x1xf32> to vector<2x256xf32>
    %8 = arith.addf %5, %7 : vector<2x256xf32>
    %cst_7 = arith.constant 0.000000e+00 : f32
    %9 = vector.broadcast %cst_7 : f32 to vector<2x256xf32>
    %10 = arith.maximumf %8, %9 : vector<2x256xf32>
    %11 = arith.truncf %10 : vector<2x256xf32> to vector<2x256xbf16>
    %c0_8 = arith.constant 0 : index
    %c0_9 = arith.constant 0 : index
    %12 = vector.load %arg5[%c0_8, %c0_9] : memref<2x256xbf16, #tpu.memory_space<vmem>>, vector<2x256xbf16>
    tpu.vector_store %arg5[%c0_8, %c0_9], %11 {strides = array<i32>} : memref<2x256xbf16, #tpu.memory_space<vmem>>, vector<2x256xbf16>,
    return
  }
  func.func @transform_0(%arg0: i32) -> (i32, i32) {
    %c0_i32 = arith.constant 0 : i32
    %c0_i32_0 = arith.constant 0 : i32
    return %c0_i32, %arg0 : i32, i32
  }
  func.func @transform_1(%arg0: i32) -> (i32, i32) {
    %c0_i32 = arith.constant 0 : i32
    %c0_i32_0 = arith.constant 0 : i32
    %c0_i32_1 = arith.constant 0 : i32
    return %c0_i32, %c0_i32_0 : i32, i32
  }
  func.func @transform_2(%arg0: i32) -> (i32, i32) {
    %c0_i32 = arith.constant 0 : i32
    %c0_i32_0 = arith.constant 0 : i32
    %c0_i32_1 = arith.constant 0 : i32
    return %c0_i32, %c0_i32_0 : i32, i32
  }
  func.func @transform_3(%arg0: i32) -> (i32, i32) {
    %c0_i32 = arith.constant 0 : i32
    %c0_i32_0 = arith.constant 0 : i32
    %c0_i32_1 = arith.constant 0 : i32
    return %c0_i32, %c0_i32_0 : i32, i32
  }
  func.func @transform_4(%arg0: i32) -> (i32, i32) {
    %c0_i32 = arith.constant 0 : i32
    %c0_i32_0 = arith.constant 0 : i32
    return %c0_i32, %arg0 : i32, i32
  }
}

module attributes {stable_mosaic.version = 11 : i64} {
  func.func @_atten_blend_kernel(%arg0: i32, %arg1: memref<18x256xbf16, #tpu.memory_space<vmem>>, %arg2: memref<18x1xf32, #tpu.memory_space<vmem>>, %arg3: memref<1x1xf32, #tpu.memory_space<vmem>>, %arg4: memref<1x1xf32, #tpu.memory_space<vmem>>, %arg5: memref<24x256xbf16, #tpu.memory_space<vmem>>, %arg6: memref<24x256xf32, #tpu.memory_space<vmem>>, %arg7: memref<24x256xbf16, #tpu.memory_space<vmem>>) attributes {dimension_semantics = [#tpu.dimension_semantics<parallel>], iteration_bounds = array<i64: 2>, scalar_prefetch = 0 : i64, scratch_operands = 0 : i64, tpu.core_type = #tpu.core_type<tc>, window_params = [{transform_indices = @transform_0, window_bounds = array<i64: 18, 256>}, {pipeline_mode = #tpu.pipeline_mode<synchronous>, transform_indices = @transform_1, window_bounds = array<i64: 18, 1>}, {pipeline_mode = #tpu.pipeline_mode<synchronous>, transform_indices = @transform_2, window_bounds = array<i64: 1, 1>}, {pipeline_mode = #tpu.pipeline_mode<synchronous>, transform_indices = @transform_3, window_bounds = array<i64: 1, 1>}, {transform_indices = @transform_4, window_bounds = array<i64: 24, 256>}, {transform_indices = @transform_5, window_bounds = array<i64: 24, 256>}, {transform_indices = @transform_6, window_bounds = array<i64: 24, 256>}]} {
    %c0 = arith.constant 0 : index
    %c0_0 = arith.constant 0 : index
    %0 = vector.load %arg1[%c0, %c0_0] : memref<18x256xbf16, #tpu.memory_space<vmem>>, vector<18x256xbf16>
    %1 = arith.extf %0 : vector<18x256xbf16> to vector<18x256xf32>
    %c0_1 = arith.constant 0 : index
    %c0_2 = arith.constant 0 : index
    %2 = vector.load %arg2[%c0_1, %c0_2] : memref<18x1xf32, #tpu.memory_space<vmem>>, vector<18x1xf32>
    %3 = vector.broadcast %2 : vector<18x1xf32> to vector<18x256xf32>
    %4 = arith.mulf %1, %3 : vector<18x256xf32>
    %cst = arith.constant dense<0.000000e+00> : vector<256xf32>
    %5 = vector.multi_reduction <add>, %4, %cst [0] : vector<18x256xf32> to vector<256xf32>
    %6 = vector.shape_cast %5 : vector<256xf32> to vector<1x256xf32>
    %c0_3 = arith.constant 0 : index
    %c0_4 = arith.constant 0 : index
    %7 = vector.load %arg3[%c0_3, %c0_4] : memref<1x1xf32, #tpu.memory_space<vmem>>, vector<1x1xf32>
    %8 = vector.broadcast %7 : vector<1x1xf32> to vector<1x256xf32>
    %9 = arith.mulf %6, %8 : vector<1x256xf32>
    %c0_5 = arith.constant 0 : index
    %c0_6 = arith.constant 0 : index
    %10 = vector.load %arg4[%c0_5, %c0_6] : memref<1x1xf32, #tpu.memory_space<vmem>>, vector<1x1xf32>
    %11 = vector.broadcast %10 : vector<1x1xf32> to vector<1x256xf32>
    %12 = arith.addf %9, %11 : vector<1x256xf32>
    %13 = arith.negf %12 : vector<1x256xf32>
    %14 = math.exp %13 : vector<1x256xf32>
    %cst_7 = arith.constant 1.000000e+00 : f32
    %15 = vector.broadcast %cst_7 : f32 to vector<1x256xf32>
    %16 = arith.addf %15, %14 : vector<1x256xf32>
    %17 = arith.divf %15, %16 : vector<1x256xf32>
    %c0_8 = arith.constant 0 : index
    %c0_9 = arith.constant 0 : index
    %18 = vector.load %arg5[%c0_8, %c0_9] : memref<24x256xbf16, #tpu.memory_space<vmem>>, vector<24x256xbf16>
    %19 = arith.extf %18 : vector<24x256xbf16> to vector<24x256xf32>
    %c0_10 = arith.constant 0 : index
    %c0_11 = arith.constant 0 : index
    %20 = vector.load %arg6[%c0_10, %c0_11] : memref<24x256xf32, #tpu.memory_space<vmem>>, vector<24x256xf32>
    %21 = vector.broadcast %17 : vector<1x256xf32> to vector<24x256xf32>
    %22 = arith.mulf %19, %21 : vector<24x256xf32>
    %cst_12 = arith.constant 1.000000e+00 : f32
    %23 = vector.broadcast %cst_12 : f32 to vector<1x256xf32>
    %24 = arith.subf %23, %17 : vector<1x256xf32>
    %25 = vector.broadcast %24 : vector<1x256xf32> to vector<24x256xf32>
    %26 = arith.mulf %20, %25 : vector<24x256xf32>
    %27 = arith.addf %22, %26 : vector<24x256xf32>
    %28 = arith.truncf %27 : vector<24x256xf32> to vector<24x256xbf16>
    %c0_13 = arith.constant 0 : index
    %c0_14 = arith.constant 0 : index
    %29 = vector.load %arg7[%c0_13, %c0_14] : memref<24x256xbf16, #tpu.memory_space<vmem>>, vector<24x256xbf16>
    tpu.vector_store %arg7[%c0_13, %c0_14], %28 {strides = array<i32>} : memref<24x256xbf16, #tpu.memory_space<vmem>>, vector<24x256xbf16>,
    return
  }
  func.func @transform_0(%arg0: i32) -> (i32, i32) {
    %c0_i32 = arith.constant 0 : i32
    %c0_i32_0 = arith.constant 0 : i32
    return %c0_i32, %arg0 : i32, i32
  }
  func.func @transform_1(%arg0: i32) -> (i32, i32) {
    %c0_i32 = arith.constant 0 : i32
    %c0_i32_0 = arith.constant 0 : i32
    %c0_i32_1 = arith.constant 0 : i32
    return %c0_i32, %c0_i32_0 : i32, i32
  }
  func.func @transform_2(%arg0: i32) -> (i32, i32) {
    %c0_i32 = arith.constant 0 : i32
    %c0_i32_0 = arith.constant 0 : i32
    %c0_i32_1 = arith.constant 0 : i32
    return %c0_i32, %c0_i32_0 : i32, i32
  }
  func.func @transform_3(%arg0: i32) -> (i32, i32) {
    %c0_i32 = arith.constant 0 : i32
    %c0_i32_0 = arith.constant 0 : i32
    %c0_i32_1 = arith.constant 0 : i32
    return %c0_i32, %c0_i32_0 : i32, i32
  }
  func.func @transform_4(%arg0: i32) -> (i32, i32) {
    %c0_i32 = arith.constant 0 : i32
    %c0_i32_0 = arith.constant 0 : i32
    return %c0_i32, %arg0 : i32, i32
  }
  func.func @transform_5(%arg0: i32) -> (i32, i32) {
    %c0_i32 = arith.constant 0 : i32
    %c0_i32_0 = arith.constant 0 : i32
    return %c0_i32, %arg0 : i32, i32
  }
  func.func @transform_6(%arg0: i32) -> (i32, i32) {
    %c0_i32 = arith.constant 0 : i32
    %c0_i32_0 = arith.constant 0 : i32
    return %c0_i32, %arg0 : i32, i32
  }
}

module attributes {stable_mosaic.version = 11 : i64} {
  func.func @_head_kernel(%arg0: i32, %arg1: memref<144x256xbf16, #tpu.memory_space<vmem>>, %arg2: memref<16x144xbf16, #tpu.memory_space<vmem>>, %arg3: memref<16x1xf32, #tpu.memory_space<vmem>>, %arg4: memref<16x1xf32, #tpu.memory_space<vmem>>, %arg5: memref<5x16xbf16, #tpu.memory_space<vmem>>, %arg6: memref<5x256xf32, #tpu.memory_space<vmem>>) attributes {dimension_semantics = [#tpu.dimension_semantics<parallel>], iteration_bounds = array<i64: 2>, scalar_prefetch = 0 : i64, scratch_operands = 0 : i64, tpu.core_type = #tpu.core_type<tc>, window_params = [{transform_indices = @transform_0, window_bounds = array<i64: 144, 256>}, {pipeline_mode = #tpu.pipeline_mode<synchronous>, transform_indices = @transform_1, window_bounds = array<i64: 16, 144>}, {pipeline_mode = #tpu.pipeline_mode<synchronous>, transform_indices = @transform_2, window_bounds = array<i64: 16, 1>}, {pipeline_mode = #tpu.pipeline_mode<synchronous>, transform_indices = @transform_3, window_bounds = array<i64: 16, 1>}, {pipeline_mode = #tpu.pipeline_mode<synchronous>, transform_indices = @transform_4, window_bounds = array<i64: 5, 16>}, {transform_indices = @transform_5, window_bounds = array<i64: 5, 256>}]} {
    %c0 = arith.constant 0 : index
    %c0_0 = arith.constant 0 : index
    %0 = vector.load %arg2[%c0, %c0_0] : memref<16x144xbf16, #tpu.memory_space<vmem>>, vector<16x144xbf16>
    %c0_1 = arith.constant 0 : index
    %c0_2 = arith.constant 0 : index
    %1 = vector.load %arg1[%c0_1, %c0_2] : memref<144x256xbf16, #tpu.memory_space<vmem>>, vector<144x256xbf16>
    %cst = arith.constant dense<0.000000e+00> : vector<16x256xf32>
    %2 = tpu.matmul %0, %1, %cst {dimension_numbers = #tpu.dot_dimension_numbers<[1], [0], [0], [1], [0, 0, 1, 1], [], []>} : vector<16x144xbf16>, vector<144x256xbf16>, vector<16x256xf32> -> vector<16x256xf32>
    %c0_3 = arith.constant 0 : index
    %c0_4 = arith.constant 0 : index
    %3 = vector.load %arg3[%c0_3, %c0_4] : memref<16x1xf32, #tpu.memory_space<vmem>>, vector<16x1xf32>
    %4 = vector.broadcast %3 : vector<16x1xf32> to vector<16x256xf32>
    %5 = arith.mulf %2, %4 : vector<16x256xf32>
    %c0_5 = arith.constant 0 : index
    %c0_6 = arith.constant 0 : index
    %6 = vector.load %arg4[%c0_5, %c0_6] : memref<16x1xf32, #tpu.memory_space<vmem>>, vector<16x1xf32>
    %7 = vector.broadcast %6 : vector<16x1xf32> to vector<16x256xf32>
    %8 = arith.addf %5, %7 : vector<16x256xf32>
    %cst_7 = arith.constant 0.000000e+00 : f32
    %9 = vector.broadcast %cst_7 : f32 to vector<16x256xf32>
    %10 = arith.maximumf %8, %9 : vector<16x256xf32>
    %c0_8 = arith.constant 0 : index
    %c0_9 = arith.constant 0 : index
    %11 = vector.load %arg5[%c0_8, %c0_9] : memref<5x16xbf16, #tpu.memory_space<vmem>>, vector<5x16xbf16>
    %12 = arith.truncf %10 : vector<16x256xf32> to vector<16x256xbf16>
    %cst_10 = arith.constant dense<0.000000e+00> : vector<5x256xf32>
    %13 = tpu.matmul %11, %12, %cst_10 {dimension_numbers = #tpu.dot_dimension_numbers<[1], [0], [0], [1], [0, 0, 1, 1], [], []>} : vector<5x16xbf16>, vector<16x256xbf16>, vector<5x256xf32> -> vector<5x256xf32>
    %c0_11 = arith.constant 0 : index
    %c0_12 = arith.constant 0 : index
    %14 = vector.load %arg6[%c0_11, %c0_12] : memref<5x256xf32, #tpu.memory_space<vmem>>, vector<5x256xf32>
    tpu.vector_store %arg6[%c0_11, %c0_12], %13 {strides = array<i32>} : memref<5x256xf32, #tpu.memory_space<vmem>>, vector<5x256xf32>,
    return
  }
  func.func @transform_0(%arg0: i32) -> (i32, i32) {
    %c0_i32 = arith.constant 0 : i32
    %c0_i32_0 = arith.constant 0 : i32
    return %c0_i32, %arg0 : i32, i32
  }
  func.func @transform_1(%arg0: i32) -> (i32, i32) {
    %c0_i32 = arith.constant 0 : i32
    %c0_i32_0 = arith.constant 0 : i32
    %c0_i32_1 = arith.constant 0 : i32
    return %c0_i32, %c0_i32_0 : i32, i32
  }
  func.func @transform_2(%arg0: i32) -> (i32, i32) {
    %c0_i32 = arith.constant 0 : i32
    %c0_i32_0 = arith.constant 0 : i32
    %c0_i32_1 = arith.constant 0 : i32
    return %c0_i32, %c0_i32_0 : i32, i32
  }
  func.func @transform_3(%arg0: i32) -> (i32, i32) {
    %c0_i32 = arith.constant 0 : i32
    %c0_i32_0 = arith.constant 0 : i32
    %c0_i32_1 = arith.constant 0 : i32
    return %c0_i32, %c0_i32_0 : i32, i32
  }
  func.func @transform_4(%arg0: i32) -> (i32, i32) {
    %c0_i32 = arith.constant 0 : i32
    %c0_i32_0 = arith.constant 0 : i32
    %c0_i32_1 = arith.constant 0 : i32
    return %c0_i32, %c0_i32_0 : i32, i32
  }
  func.func @transform_5(%arg0: i32) -> (i32, i32) {
    %c0_i32 = arith.constant 0 : i32
    %c0_i32_0 = arith.constant 0 : i32
    return %c0_i32, %arg0 : i32, i32
  }
}

module attributes {stable_mosaic.version = 11 : i64} {
  func.func @_conv_kernel(%arg0: i32, %arg1: memref<216x256xbf16, #tpu.memory_space<vmem>>, %arg2: memref<16x216xbf16, #tpu.memory_space<vmem>>, %arg3: memref<16x1xf32, #tpu.memory_space<vmem>>, %arg4: memref<16x1xf32, #tpu.memory_space<vmem>>, %arg5: memref<16x256xbf16, #tpu.memory_space<vmem>>) attributes {dimension_semantics = [#tpu.dimension_semantics<parallel>], iteration_bounds = array<i64: 2>, scalar_prefetch = 0 : i64, scratch_operands = 0 : i64, tpu.core_type = #tpu.core_type<tc>, window_params = [{transform_indices = @transform_0, window_bounds = array<i64: 216, 256>}, {pipeline_mode = #tpu.pipeline_mode<synchronous>, transform_indices = @transform_1, window_bounds = array<i64: 16, 216>}, {pipeline_mode = #tpu.pipeline_mode<synchronous>, transform_indices = @transform_2, window_bounds = array<i64: 16, 1>}, {pipeline_mode = #tpu.pipeline_mode<synchronous>, transform_indices = @transform_3, window_bounds = array<i64: 16, 1>}, {transform_indices = @transform_4, window_bounds = array<i64: 16, 256>}]} {
    %c0 = arith.constant 0 : index
    %c0_0 = arith.constant 0 : index
    %0 = vector.load %arg2[%c0, %c0_0] : memref<16x216xbf16, #tpu.memory_space<vmem>>, vector<16x216xbf16>
    %c0_1 = arith.constant 0 : index
    %c0_2 = arith.constant 0 : index
    %1 = vector.load %arg1[%c0_1, %c0_2] : memref<216x256xbf16, #tpu.memory_space<vmem>>, vector<216x256xbf16>
    %cst = arith.constant dense<0.000000e+00> : vector<16x256xf32>
    %2 = tpu.matmul %0, %1, %cst {dimension_numbers = #tpu.dot_dimension_numbers<[1], [0], [0], [1], [0, 0, 1, 1], [], []>} : vector<16x216xbf16>, vector<216x256xbf16>, vector<16x256xf32> -> vector<16x256xf32>
    %c0_3 = arith.constant 0 : index
    %c0_4 = arith.constant 0 : index
    %3 = vector.load %arg3[%c0_3, %c0_4] : memref<16x1xf32, #tpu.memory_space<vmem>>, vector<16x1xf32>
    %4 = vector.broadcast %3 : vector<16x1xf32> to vector<16x256xf32>
    %5 = arith.mulf %2, %4 : vector<16x256xf32>
    %c0_5 = arith.constant 0 : index
    %c0_6 = arith.constant 0 : index
    %6 = vector.load %arg4[%c0_5, %c0_6] : memref<16x1xf32, #tpu.memory_space<vmem>>, vector<16x1xf32>
    %7 = vector.broadcast %6 : vector<16x1xf32> to vector<16x256xf32>
    %8 = arith.addf %5, %7 : vector<16x256xf32>
    %cst_7 = arith.constant 0.000000e+00 : f32
    %9 = vector.broadcast %cst_7 : f32 to vector<16x256xf32>
    %10 = arith.maximumf %8, %9 : vector<16x256xf32>
    %11 = arith.truncf %10 : vector<16x256xf32> to vector<16x256xbf16>
    %c0_8 = arith.constant 0 : index
    %c0_9 = arith.constant 0 : index
    %12 = vector.load %arg5[%c0_8, %c0_9] : memref<16x256xbf16, #tpu.memory_space<vmem>>, vector<16x256xbf16>
    tpu.vector_store %arg5[%c0_8, %c0_9], %11 {strides = array<i32>} : memref<16x256xbf16, #tpu.memory_space<vmem>>, vector<16x256xbf16>,
    return
  }
  func.func @transform_0(%arg0: i32) -> (i32, i32) {
    %c0_i32 = arith.constant 0 : i32
    %c0_i32_0 = arith.constant 0 : i32
    return %c0_i32, %arg0 : i32, i32
  }
  func.func @transform_1(%arg0: i32) -> (i32, i32) {
    %c0_i32 = arith.constant 0 : i32
    %c0_i32_0 = arith.constant 0 : i32
    %c0_i32_1 = arith.constant 0 : i32
    return %c0_i32, %c0_i32_0 : i32, i32
  }
  func.func @transform_2(%arg0: i32) -> (i32, i32) {
    %c0_i32 = arith.constant 0 : i32
    %c0_i32_0 = arith.constant 0 : i32
    %c0_i32_1 = arith.constant 0 : i32
    return %c0_i32, %c0_i32_0 : i32, i32
  }
  func.func @transform_3(%arg0: i32) -> (i32, i32) {
    %c0_i32 = arith.constant 0 : i32
    %c0_i32_0 = arith.constant 0 : i32
    %c0_i32_1 = arith.constant 0 : i32
    return %c0_i32, %c0_i32_0 : i32, i32
  }
  func.func @transform_4(%arg0: i32) -> (i32, i32) {
    %c0_i32 = arith.constant 0 : i32
    %c0_i32_0 = arith.constant 0 : i32
    return %c0_i32, %arg0 : i32, i32
  }
}

</mosaic_0001>

<bundles_post_ra>
// kernel: ppliteseg_forward.6
= control target key start
LH: loop header
LB: loop body
LE: loop exit
PB: predicated region body
PF: predicated region fallthrough
CT: control target
= control target key end

     0   :  { %s580_s15 = smov 0   ;;  %s582_s16 = smov 0   ;;  %s659_s0 = inlined_call_operand.vmem [shape: bf16[27,512], index: 0, kind: input, shape index: {}]   ;;  %s660_s1 = inlined_call_operand.vmem [shape: bf16[16,27], index: 1, kind: input, shape index: {}]   ;;  %s661_s2 = inlined_call_operand.vmem [shape: f32[16,1], index: 2, kind: input, shape index: {}]   ;;  %s662_s3 = inlined_call_operand.vmem [shape: f32[16,1], index: 3, kind: input, shape index: {}]   ;;  %s663_s4 = inlined_call_operand.vmem [shape: bf16[16,512], index: 4, kind: output, shape index: {}]  }
   0x1   :  { %s584_s17 = smov 0  }
   0x2 LB: > { %s457_s18 = sadd.s32 4294967295, %s551_s17   ;;  %s597_s19 = sadd.s32 1, %s551_s17   ;;  %s551_s17 = sphi %s584_s17, %s667_s17   ;;  %s547_s16 = sphi %s582_s16, %s666_s16   ;;  %s543_s15 = sphi %s580_s15, %s665_s15  }
   0x3   : > { %s18_s20 = ssub.s32 %s551_s17, %s597_s19  ;;  %s21_s21 = sadd.s32 1, %s547_s16 }
   0x4   : > { %p19_p0 = scmp.eq.s32.totalorder %s18_s20, 0  ;;  %p28_p1 = scmp.ne.s32.totalorder %s547_s16, %s543_s15 }
   0x5   : > { %p29_p2 = scmp.eq.s32.totalorder %s551_s17, 0  ;;  %p121_p3 = scmp.eq.s32.totalorder %s457_s18, 1 }
   0x6   : > { %s608_s22 = scalar_select %p19_p0, %s547_s16, %s21_s21  }
   0x7   : > { %p30_p4 = por %p29_p2, %p28_p1  ;;  %p610_p5 = por %p121_p3, %p28_p1 }
   0x8   : > { %p460_p6 = scmp.ge.s32.totalorder %s551_s17, 2 }
   0xa   : > { %152 = sbr.rel (%p460_p6) target bundleno = 23 (0x17), region = 28 }
   0xf   : > { %155 = sbr.rel (!%p30_p4) target bundleno = 23 (0x17), region = 32  ;;  %s157_s24 = sand.u32 (%p30_p4), 1, %s547_s16  }
  0x10   : > { %s494_s25 = sshll.u32 (%p30_p4), %s551_s17, 3  ;;  %s461_s26 = sshll.u32 (%p30_p4), %s157_s24, 5 }
  0x11   : > { %s162_s29 = scalar_lea.vmem (%p30_p4), %s659_s0, %s494_s25  ;;  %s159_s30 = scalar_lea.vmem (%p30_p4), [#allocation2], %s461_s26 }
  0x12   : > { %v197_v0 = vld [vmem:[%s162_s29] sm:$0xff] (%p30_p4)  ;;  %v199_v1 = vld [vmem:[%s162_s29 + $0x10] sm:$0xff] (%p30_p4) }
  0x13   : > { %v201_v2 = vld [vmem:[%s162_s29 + $0x20] sm:$0xff] (%p30_p4)  ;;  %198 = vst [vmem:[%s159_s30] sm:$0xff] (%p30_p4), %v197_v0  ;;  %v203_v3 = vld [vmem:[%s162_s29 + $0x30] sm:$0xff] (%p30_p4) }
  0x14   : > { %200 = vst [vmem:[%s159_s30 + $0x8] sm:$0xff] %v199_v1 }
  0x15   : > { %202 = vst [vmem:[%s159_s30 + $0x10] sm:$0xff] %v201_v2 }
  0x16   : > { %204 = vst [vmem:[%s159_s30 + $0x18] sm:$0xff] %v203_v3 }
  0x17 PF: > { %p464_p7 = scmp.ge.s32.totalorder %s551_s17, 1  ;;  %p209_p8 = scmp.lt.s32.totalorder %s551_s17, 3 }
  0x19   : > { %p210_p9 = pnand %p464_p7, %p209_p8 }
  0x1a   : > { %s216_s5 = sand.u32 (!%p210_p9), 1, %s543_s15  }
  0x1b   : > { %213 = sbr.rel (%p210_p9) target bundleno = 197 (0xc5), region = 70  ;;  %s465_s6 = sshll.u32 (!%p210_p9), %s216_s5, 5 }
  0x1c   : > { %s218_s11 = scalar_lea.vmem (!%p210_p9), [#allocation2], %s465_s6  ;;  %s466_s25 = sshll.u32 (!%p210_p9), %s216_s5, 4 }
  0x1d   : > { %s239_s26 = scalar_lea.vmem (!%p210_p9), [#allocation3], %s466_s25 }
  0x20   : > { %vm276_vm0 = vcmask 1044480   ;;  %vm277_vm1 = vcmask 1045504   ;;  %v553_v4 = vmov 65535   ;;  %v314_v6 = vld [vmem:[%s661_s2] sm:$0xff]  ;;  %v554_v9 = vmov 0   ;;  %v315_v23 = vld [vmem:[%s661_s2 + $0x8] sm:$0xff] }
  0x21   : > { %v278_v5 = vsel %vm276_vm0, 4294967295, %v553_v4  ;;  %v330_v7 = vld [vmem:[%s662_s3] sm:$0xff]  ;;  %527 = vset.pattern.permute.xlu0 %v554_v9  ;;  %528 = vset.pattern.permute.xlu1 %v554_v9  ;;  %v481_v10 = vld [vmem:[%s218_s11 + $0x10] sm:$0xf]  ;;  %v499_v11 = vld [vmem:[%s218_s11 + $0x14] sm:$0x30] }
  0x22   : > { %v279_v8 = vsel %vm277_vm1, %v278_v5, 0  ;;  %v498_v12 = vld [vmem:[%s218_s11 + $0x14] sm:$0xf]  ;;  %318 = vperm.xlu0 %527, %v314_v6   ;;  %334 = vperm.xlu1 %528, %v330_v7   ;;  %v482_v13 = vor.u32 %v499_v11, %v481_v10  ;;  %v483_v14 = vld [vmem:[%s218_s11 + $0x18] sm:$0x30]  ;;  %v331_v24 = vld [vmem:[%s662_s3 + $0x8] sm:$0xff] }
  0x23   : > { %v486_v15 = vor.u32 %v498_v12, %v483_v14  ;;  %v473_v16 = vld [vmem:[%s218_s11] sm:$0xf]  ;;  %v497_v17 = vld [vmem:[%s218_s11 + $0x4] sm:$0xf0]  ;;  %v496_v19 = vld [vmem:[%s218_s11 + $0x4] sm:$0xf] }
  0x24   : > { %v281_v18 = vand.u32 %v482_v13, %v279_v8  ;;  %v475_v20 = vld [vmem:[%s218_s11 + $0x8] sm:$0xf0]  ;;  %v474_v22 = vor.u32 %v497_v17, %v473_v16  ;;  %v495_v26 = vld [vmem:[%s660_s1] sm:$0xff]  ;;  %vm272_vm2 = vcmask 220160   ;;  %s500_s15 = sshll.u32 (%p610_p5), %s457_s18, 3 }
  0x25   : > { %v284_v21 = vand.u32 %v486_v15, %v279_v8  ;;  %v478_v25 = vor.u32 %v496_v19, %v475_v20  ;;  %s363_s29 = scalar_lea.vmem (%p610_p5), %s663_s4, %s500_s15 }
  0x26   : > { %292 = vmatpush.bf16.msra.mxu0 %v281_v18 }
  0x27   : > { %306 = vmatpush.bf16.msra.mxu1 %v284_v21 }
  0x2a   : > { %323 = vperm.xlu0 %527, %v315_v23   ;;  %339 = vperm.xlu1 %528, %v331_v24  }
  0x2b   : > { %293 = vmatpush.bf16.msra.mxu0 %v474_v22  ;;  %307 = vmatpush.bf16.msra.mxu1 %v478_v25 }
  0x2e   : > { %487 = vmatmul.msk.bf16.vlgmr.msra.gmra.mxu0 %vm272_vm2, %v495_v26  ;;  %488 = vmatmul.msk.bf16.vlgmr.msra.gmra.mxu1 %vm272_vm2, %v495_v26 }
  0x94   : > { %v319_v27 = vpop.permute.xlu0 %318  ;;  %v335_v28 = vpop.permute.xlu1 %334 }
  0x9c   : > { %v324_v37 = vpop.permute.xlu0 %323  ;;  %v340_v42 = vpop.permute.xlu1 %339 }
  0xab   : > { %v295_v29 = vpop.f32.mrf.mxu0  ;;  %v309_v31 = vpop.f32.mrf.mxu1 }
  0xac   : > { %v326_v30 = vmul.f32 %v319_v27, %v295_v29  ;;  %v327_v32 = vmul.f32 %v319_v27, %v309_v31 }
  0xae   : > { %v342_v33 = vadd.f32 %v335_v28, %v326_v30  ;;  %v343_v34 = vadd.f32 %v335_v28, %v327_v32 }
  0xb0   : > { %v346_v35 = vmax.f32 %v342_v33, 0.0  ;;  %v347_v36 = vmax.f32 %v343_v34, 0.0 }
  0xb2   : > { %v350_v38 = vpack.c.bf16 %v347_v36, %v346_v35 }
  0xb3   : > { %v297_v39 = vpop.f32.mrf.mxu0  ;;  %v311_v41 = vpop.f32.mrf.mxu1 }
  0xb4   : > { %v328_v40 = vmul.f32 %v324_v37, %v297_v39  ;;  %352 = vst [vmem:[%s239_s26] sm:$0xff] %v350_v38  ;;  %v329_v43 = vmul.f32 %v324_v37, %v311_v41 }
  0xb6   : > { %v344_v44 = vadd.f32 %v340_v42, %v328_v40  ;;  %v345_v45 = vadd.f32 %v340_v42, %v329_v43 }
  0xb8   : > { %v348_v46 = vmax.f32 %v344_v44, 0.0  ;;  %v349_v47 = vmax.f32 %v345_v45, 0.0  ;;  %360 = sbr.rel (!%p610_p5) target bundleno = 197 (0xc5), region = 78 }
  0xba   : > { %v351_v48 = vpack.c.bf16 %v349_v47, %v348_v46 }
  0xbb   : > { %v394_v49 = vld [vmem:[%s239_s26] sm:$0xff] (%p610_p5) }
  0xbc   : > { %353 = vst [vmem:[%s239_s26 + $0x8] sm:$0xff] %v351_v48 }
  0xbd   : > { %395 = vst [vmem:[%s363_s29] sm:$0xff] %v394_v49 }
  0xc3   : > { %v396_v50 = vld [vmem:[%s239_s26 + $0x8] sm:$0xff] }
  0xc4   : > { %397 = vst [vmem:[%s363_s29 + $0x10] sm:$0xff] %v396_v50 }
  0xc5 PF: > { %p11_p10 = scmp.ge.s32.totalorder %s597_s19, 4   ;;  %s665_s15 = smov %s547_s16 }
  0xc6   : > { %s666_s16 = smov %s608_s22  ;;  %s667_s17 = smov %s597_s19 }
  0xc7   :  { %13 = sbr.rel (!%p11_p10) target bundleno = 2 (0x2), region = 147 }

// kernel: ppliteseg_forward.7
= control target key start
LH: loop header
LB: loop body
LE: loop exit
PB: predicated region body
PF: predicated region fallthrough
CT: control target
= control target key end

     0   :  { %s1159_s21 = smov 0   ;;  %s1161_s22 = smov 0   ;;  %s1387_s0 = inlined_call_operand.vmem [shape: bf16[144,512], index: 0, kind: input, shape index: {}]   ;;  %s1388_s1 = inlined_call_operand.vmem [shape: bf16[24,144], index: 1, kind: input, shape index: {}]   ;;  %s1389_s2 = inlined_call_operand.vmem [shape: f32[24,1], index: 2, kind: input, shape index: {}]   ;;  %s1390_s3 = inlined_call_operand.vmem [shape: f32[24,1], index: 3, kind: input, shape index: {}]   ;;  %s1391_s4 = inlined_call_operand.vmem [shape: f32[24,512], index: 4, kind: input, shape index: {}]   ;;  %s1392_s5 = inlined_call_operand.vmem [shape: bf16[24,512], index: 5, kind: output, shape index: {0}]   ;;  %s1393_s6 = inlined_call_operand.vmem [shape: bf16[4,512], index: 6, kind: output, shape index: {1}]  }
   0x1   :  { %s1163_s23 = smov 0  }
   0x2 LB: > { %s1175_s24 = sadd.s32 4294967295, %s1120_s23   ;;  %s1178_s25 = sadd.s32 1, %s1120_s23   ;;  %s1120_s23 = sphi %s1163_s23, %s1398_s23   ;;  %s1116_s22 = sphi %s1161_s22, %s1397_s22   ;;  %s1112_s21 = sphi %s1159_s21, %s1396_s21  }
   0x3   : > { %s21_s26 = ssub.s32 %s1120_s23, %s1178_s25  ;;  %s24_s27 = sadd.s32 1, %s1116_s22 }
   0x4   : > { %p22_p0 = scmp.eq.s32.totalorder %s21_s26, 0  ;;  %p31_p1 = scmp.ne.s32.totalorder %s1116_s22, %s1112_s21 }
   0x5   : > { %p32_p2 = scmp.eq.s32.totalorder %s1120_s23, 0  ;;  %p150_p3 = scmp.eq.s32.totalorder %s1175_s24, 1 }
   0x6   : > { %s1188_s28 = scalar_select %p22_p0, %s1116_s22, %s24_s27  }
   0x7   : > { %p1190_p4 = por %p32_p2, %p31_p1  ;;  %p1194_p5 = por %p150_p3, %p31_p1 }
   0x8   : > { %p943_p6 = scmp.ge.s32.totalorder %s1120_s23, 2 }
   0xa   : > { %207 = sbr.rel (%p943_p6) target bundleno = 47 (0x2f), region = 28 }
   0xf   : > { %210 = sbr.rel (!%p1190_p4) target bundleno = 37 (0x25), region = 32  ;;  %s212_s7 = sand.u32 (%p1190_p4), 1, %s1116_s22  }
  0x10   : > { %s1039_s8 = sshll.u32 (%p1190_p4), %s1120_s23, 3  ;;  %s1062_s9 = smul.u32 (%p1190_p4), 144, %s212_s7 }
  0x11   : > { %s1206_s12 = scalar_lea.vmem (%p1190_p4), %s1387_s0, %s1039_s8 }
  0x12   : > { %v280_v0 = vld [vmem:[%s1206_s12] sm:$0xff] (%p1190_p4)  ;;  %v282_v1 = vld [vmem:[%s1206_s12 + $0x10] sm:$0xff] (%p1190_p4)  ;;  %s1211_s13 = scalar_lea.vmem (%p1190_p4), [#allocation2], %s1062_s9 }
  0x13   : > { %v284_v2 = vld [vmem:[%s1206_s12 + $0x20] sm:$0xff] (%p1190_p4)  ;;  %281 = vst [vmem:[%s1211_s13] sm:$0xff] (%p1190_p4), %v280_v0  ;;  %v286_v3 = vld [vmem:[%s1206_s12 + $0x30] sm:$0xff] (%p1190_p4) }
  0x14   : > { %283 = vst [vmem:[%s1211_s13 + $0x8] sm:$0xff] %v282_v1  ;;  %v288_v4 = vld [vmem:[%s1206_s12 + $0x40] sm:$0xff]  ;;  %v290_v5 = vld [vmem:[%s1206_s12 + $0x50] sm:$0xff] }
  0x15   : > { %285 = vst [vmem:[%s1211_s13 + $0x10] sm:$0xff] %v284_v2  ;;  %v292_v6 = vld [vmem:[%s1206_s12 + $0x60] sm:$0xff]  ;;  %v294_v7 = vld [vmem:[%s1206_s12 + $0x70] sm:$0xff] }
  0x16   : > { %287 = vst [vmem:[%s1211_s13 + $0x18] sm:$0xff] %v286_v3  ;;  %v296_v8 = vld [vmem:[%s1206_s12 + $0x80] sm:$0xff]  ;;  %v298_v9 = vld [vmem:[%s1206_s12 + $0x90] sm:$0xff] }
  0x17   : > { %289 = vst [vmem:[%s1211_s13 + $0x20] sm:$0xff] %v288_v4  ;;  %v300_v10 = vld [vmem:[%s1206_s12 + $0xa0] sm:$0xff]  ;;  %v302_v11 = vld [vmem:[%s1206_s12 + $0xb0] sm:$0xff] }
  0x18   : > { %291 = vst [vmem:[%s1211_s13 + $0x28] sm:$0xff] %v290_v5  ;;  %v304_v12 = vld [vmem:[%s1206_s12 + $0xc0] sm:$0xff]  ;;  %v306_v13 = vld [vmem:[%s1206_s12 + $0xd0] sm:$0xff] }
  0x19   : > { %293 = vst [vmem:[%s1211_s13 + $0x30] sm:$0xff] %v292_v6  ;;  %v308_v14 = vld [vmem:[%s1206_s12 + $0xe0] sm:$0xff]  ;;  %v310_v15 = vld [vmem:[%s1206_s12 + $0xf0] sm:$0xff] }
  0x1a   : > { %295 = vst [vmem:[%s1211_s13 + $0x38] sm:$0xff] %v294_v7  ;;  %v312_v16 = vld [vmem:[%s1206_s12 + $0x100] sm:$0xff]  ;;  %v314_v17 = vld [vmem:[%s1206_s12 + $0x110] sm:$0xff] }
  0x1b   : > { %297 = vst [vmem:[%s1211_s13 + $0x40] sm:$0xff] %v296_v8 }
  0x1c   : > { %299 = vst [vmem:[%s1211_s13 + $0x48] sm:$0xff] %v298_v9 }
  0x1d   : > { %301 = vst [vmem:[%s1211_s13 + $0x50] sm:$0xff] %v300_v10 }
  0x1e   : > { %303 = vst [vmem:[%s1211_s13 + $0x58] sm:$0xff] %v302_v11 }
  0x1f   : > { %305 = vst [vmem:[%s1211_s13 + $0x60] sm:$0xff] %v304_v12 }
  0x20   : > { %307 = vst [vmem:[%s1211_s13 + $0x68] sm:$0xff] %v306_v13 }
  0x21   : > { %309 = vst [vmem:[%s1211_s13 + $0x70] sm:$0xff] %v308_v14 }
  0x22   : > { %311 = vst [vmem:[%s1211_s13 + $0x78] sm:$0xff] %v310_v15 }
  0x23   : > { %313 = vst [vmem:[%s1211_s13 + $0x80] sm:$0xff] %v312_v16 }
  0x24   : > { %315 = vst [vmem:[%s1211_s13 + $0x88] sm:$0xff] %v314_v17 }
  0x25 PF: > { %321 = sbr.rel (!%p1190_p4) target bundleno = 47 (0x2f), region = 70  ;;  %s323_s14 = sand.u32 (%p1190_p4), 1, %s1116_s22  }
  0x26   : > { %s1040_s15 = sshll.u32 (%p1190_p4), %s1120_s23, 4  ;;  %s1063_s16 = smul.u32 (%p1190_p4), 48, %s323_s14 }
  0x27   : > { %s328_s19 = scalar_lea.vmem (%p1190_p4), %s1391_s4, %s1040_s15 }
  0x28   : > { %v341_v18 = vld [vmem:[%s328_s19] sm:$0xff] (%p1190_p4)  ;;  %v343_v19 = vld [vmem:[%s328_s19 + $0x8] sm:$0xff] (%p1190_p4)  ;;  %s325_s20 = scalar_lea.vmem (%p1190_p4), [#allocation3], %s1063_s16 }
  0x29   : > { %v345_v20 = vld [vmem:[%s328_s19 + $0x20] sm:$0xff] (%p1190_p4)  ;;  %342 = vst [vmem:[%s325_s20] sm:$0xff] (%p1190_p4), %v341_v18  ;;  %v347_v21 = vld [vmem:[%s328_s19 + $0x28] sm:$0xff] (%p1190_p4) }
  0x2a   : > { %344 = vst [vmem:[%s325_s20 + $0x8] sm:$0xff] %v343_v19  ;;  %v349_v22 = vld [vmem:[%s328_s19 + $0x40] sm:$0xff]  ;;  %v351_v23 = vld [vmem:[%s328_s19 + $0x48] sm:$0xff] }
  0x2b   : > { %346 = vst [vmem:[%s325_s20 + $0x10] sm:$0xff] %v345_v20 }
  0x2c   : > { %348 = vst [vmem:[%s325_s20 + $0x18] sm:$0xff] %v347_v21 }
  0x2d   : > { %350 = vst [vmem:[%s325_s20 + $0x20] sm:$0xff] %v349_v22 }
  0x2e   : > { %352 = vst [vmem:[%s325_s20 + $0x28] sm:$0xff] %v351_v23 }
  0x2f PF: > { %p948_p7 = scmp.ge.s32.totalorder %s1120_s23, 1  ;;  %p357_p8 = scmp.lt.s32.totalorder %s1120_s23, 3 }
  0x31   : > { %p358_p9 = pnand %p948_p7, %p357_p8 }
  0x32   : > { %s1256_s26 = sand.u32 (!%p358_p9), 1, %s1112_s21   ;;  %s949_s12 = sshll.u32 (!%p358_p9), %s1175_s24, 1 }
  0x33   : > { %361 = sbr.rel (%p358_p9) target bundleno = 272 (0x110), region = 93  ;;  %p412_p10 = scmp.lt.s32.totalorder (!%p358_p9), %s949_s12, 3 }
  0x34   : > { %s1064_s27 = smul.u32 (!%p358_p9), 144, %s1256_s26 }
  0x35   : > { %s1066_s11 = smul.u32 (!%p358_p9), 24, %s1256_s26 }
  0x36   : > { %s1259_s29 = scalar_lea.vmem (!%p358_p9), [#allocation2], %s1064_s27 }
  0x38   : > { %v1017_v24 = vld [vmem:[%s1259_s29 + $0x70] sm:$0xf]  ;;  %v1058_v25 = vld [vmem:[%s1259_s29 + $0x74] sm:$0xf0]  ;;  %v1057_v26 = vld [vmem:[%s1259_s29 + $0x74] sm:$0xf] }
  0x39   : > { %v1018_v27 = vor.u32 %v1058_v25, %v1017_v24  ;;  %v1019_v28 = vld [vmem:[%s1259_s29 + $0x78] sm:$0xf0]  ;;  %v1009_v29 = vld [vmem:[%s1259_s29 + $0x60] sm:$0xf]  ;;  %v1056_v30 = vld [vmem:[%s1259_s29 + $0x64] sm:$0xf0] }
  0x3a   : > { %v1022_v31 = vor.u32 %v1057_v26, %v1019_v28  ;;  %v1055_v32 = vld [vmem:[%s1259_s29 + $0x64] sm:$0xf]  ;;  %v1011_v33 = vld [vmem:[%s1259_s29 + $0x68] sm:$0xf0]  ;;  %v1010_v34 = vor.u32 %v1056_v30, %v1009_v29  ;;  %v1001_v36 = vld [vmem:[%s1259_s29 + $0x50] sm:$0xf] }
  0x3b   : > { %551 = vmatpush.bf16.msra.mxu0 %v1018_v27  ;;  %v1014_v35 = vor.u32 %v1055_v32, %v1011_v33  ;;  %v1054_v37 = vld [vmem:[%s1259_s29 + $0x54] sm:$0xf0]  ;;  %v1053_v38 = vld [vmem:[%s1259_s29 + $0x54] sm:$0xf]  ;;  %v1003_v39 = vld [vmem:[%s1259_s29 + $0x58] sm:$0xf0] }
  0x3c   : > { %587 = vmatpush.bf16.msra.mxu2 %v1022_v31  ;;  %v1002_v40 = vor.u32 %v1054_v37, %v1001_v36  ;;  %v993_v41 = vld [vmem:[%s1259_s29 + $0x40] sm:$0xf]  ;;  %v1041_v42 = vld [vmem:[%s1388_s1 + $0x4] sm:$0xf]  ;;  %v955_v43 = vld [vmem:[%s1388_s1 + $0x8] sm:$0xf0]  ;;  %v1006_v44 = vor.u32 %v1053_v38, %v1003_v39 }
  0x3d   : > { %v1052_v45 = vld [vmem:[%s1259_s29 + $0x44] sm:$0xf0]  ;;  %v1059_v46 = vld [vmem:[%s1259_s29 + $0x84] sm:$0xf]  ;;  %v1027_v47 = vld [vmem:[%s1259_s29 + $0x88] sm:$0xf0]  ;;  %v958_v51 = vor.u32 %v1041_v42, %v955_v43 }
  0x3e   : > { %v1051_v48 = vld [vmem:[%s1259_s29 + $0x44] sm:$0xf]  ;;  %v995_v49 = vld [vmem:[%s1259_s29 + $0x48] sm:$0xf0]  ;;  %v1030_v50 = vor.u32 %v1059_v46, %v1027_v47  ;;  %v1025_v52 = vld [vmem:[%s1259_s29 + $0x80] sm:$0xf]  ;;  %v994_v54 = vor.u32 %v1052_v45, %v993_v41 }
  0x3f   : > { %552 = vmatpush.bf16.msra.mxu0 %v1010_v34  ;;  %v1060_v53 = vld [vmem:[%s1259_s29 + $0x84] sm:$0xf0]  ;;  %vm544_vm0 = vcmask 130048   ;;  %v998_v56 = vor.u32 %v1051_v48, %v995_v49  ;;  %v985_v57 = vld [vmem:[%s1259_s29 + $0x30] sm:$0xf]  ;;  %v1122_v61 = vmov 0  }
  0x40   : > { %588 = vmatpush.bf16.msra.mxu2 %v1014_v35  ;;  %612 = vmatpush.bf16.msra.mxu3 %v1030_v50  ;;  %v1026_v55 = vor.u32 %v1060_v53, %v1025_v52  ;;  %v1050_v58 = vld [vmem:[%s1259_s29 + $0x34] sm:$0xf0]  ;;  %v1049_v59 = vld [vmem:[%s1259_s29 + $0x34] sm:$0xf]  ;;  %v987_v60 = vld [vmem:[%s1259_s29 + $0x38] sm:$0xf0] }
  0x41   : > { %1094 = vset.pattern.permute.xlu1 %v1122_v61  ;;  %v625_v62 = vld [vmem:[%s1389_s2 + $0x10] sm:$0xff]  ;;  %1093 = vset.pattern.permute.xlu0 %v1122_v61  ;;  %v623_v63 = vld [vmem:[%s1389_s2] sm:$0xff]  ;;  %v986_v0 = vor.u32 %v1050_v58, %v985_v57  ;;  %v990_v1 = vor.u32 %v1049_v59, %v987_v60  ;;  %v1048_v3 = vld [vmem:[%s1259_s29 + $0x24] sm:$0xf0]  ;;  %vm764_vm2 = vcmask 1040384   ;;  %vm767_vm3 = vcmask 1041408  }
  0x42   : > { %576 = vmatpush.bf16.msra.mxu1 %v1026_v55  ;;  %638 = vperm.xlu1 %1094, %v625_v62   ;;  %v977_v2 = vld [vmem:[%s1259_s29 + $0x20] sm:$0xf]  ;;  %v1047_v4 = vld [vmem:[%s1259_s29 + $0x24] sm:$0xf]  ;;  %v979_v5 = vld [vmem:[%s1259_s29 + $0x28] sm:$0xf0] }
  0x43   : > { %553 = vmatpush.bf16.msra.mxu0 %v1002_v40  ;;  %1033 = vmatmul.msk.bf16.vlgmr.msra.gmra.mxu3 %vm544_vm0, %v958_v51  ;;  %v978_v6 = vor.u32 %v1048_v3, %v977_v2  ;;  %v420_v7 = vld [vmem:[%s1388_s1 + $0x10] sm:$0xff]  ;;  %v648_v8 = vld [vmem:[%s1390_s3 + $0x8] sm:$0xff]  ;;  %v982_v9 = vor.u32 %v1047_v4, %v979_v5  ;;  %v647_v12 = vld [vmem:[%s1390_s3] sm:$0xff]  ;;  %v1123_v62 = vmov 24.0   ;;  %s1400_s12 = smov (!%p412_p10, %s949_s12), 3  ;;  %vm770_vm4 = vcmask 1042432  }
  0x44   : > { %589 = vmatpush.bf16.msra.mxu2 %v1006_v44  ;;  %628 = vperm.xlu0 %1093, %v623_v63   ;;  %v969_v10 = vld [vmem:[%s1259_s29 + $0x10] sm:$0xf]  ;;  %v1046_v11 = vld [vmem:[%s1259_s29 + $0x14] sm:$0xf0]  ;;  %v1045_v13 = vld [vmem:[%s1259_s29 + $0x14] sm:$0xf]  ;;  %v447_v15 = vunpack.c.h.b16 %v420_v7  ;;  %v446_v30 = vunpack.c.l.b16 %v420_v7  ;;  %1096 = vrcp.f32 %v1123_v62 }
  0x45   : > { %1031 = vmatmul.msk.bf16.vlgmr.msra.gmra.mxu1 %vm544_vm0, %v958_v51  ;;  %1095 = vset.pattern.permute.xlu2 %v1122_v61  ;;  %v971_v14 = vld [vmem:[%s1259_s29 + $0x18] sm:$0xf0]  ;;  %v970_v17 = vor.u32 %v1046_v11, %v969_v10  ;;  %v961_v19 = vld [vmem:[%s1259_s29] sm:$0xf]  ;;  %v1044_v20 = vld [vmem:[%s1259_s29 + $0x4] sm:$0xf0] }
  0x46   : > { %657 = vperm.xlu2 %1095, %v648_v8   ;;  %v624_v16 = vld [vmem:[%s1389_s2 + $0x8] sm:$0xff]  ;;  %v974_v18 = vor.u32 %v1045_v13, %v971_v14  ;;  %v1043_v21 = vld [vmem:[%s1259_s29 + $0x4] sm:$0xf]  ;;  %v451_v24 = vpack.c.b16 %v447_v15, %v447_v15  ;;  %v962_v25 = vor.u32 %v1044_v20, %v961_v19  ;;  %v953_v26 = vld [vmem:[%s1388_s1] sm:$0xf]  ;;  %v450_v31 = vpack.c.b16 %v446_v30, %v446_v30  ;;  %s950_s13 = sshll.u32 %s1400_s12, 1 }
  0x47   : > { %554 = vmatpush.bf16.msra.mxu0 %v994_v54  ;;  %v963_v22 = vld [vmem:[%s1259_s29 + $0x8] sm:$0xf0]  ;;  %v649_v23 = vld [vmem:[%s1390_s3 + $0x10] sm:$0xff]  ;;  %v1042_v27 = vld [vmem:[%s1388_s1 + $0x4] sm:$0xf0]  ;;  %s1065_s29 = smul.u32 48, %s1256_s26  ;;  %s415_s16 = scalar_lea.vmem %s1393_s6, %s950_s13 }
  0x48   : > { %590 = vmatpush.bf16.msra.mxu2 %v998_v56  ;;  %v966_v28 = vor.u32 %v1043_v21, %v963_v22  ;;  %v954_v29 = vor.u32 %v1042_v27, %v953_v26  ;;  %s1343_s26 = scalar_lea.vmem [#allocation4], %s1066_s11  ;;  %s1061_s17 = sshll.u32 (%p1194_p5), %s1175_s24, 3 }
  0x49   : > { %s373_s10 = scalar_lea.vmem [#allocation3], %s1065_s29  ;;  %s795_s20 = scalar_lea.vmem (%p1194_p5), %s1392_s5, %s1061_s17 }
  0x4a   : > { %652 = vperm.xlu1 %1094, %v647_v12   ;;  %v677_v50 = vld [vmem:[%s373_s10] sm:$0xff]  ;;  %v679_v51 = vld [vmem:[%s373_s10 + $0x10] sm:$0xff]  ;;  %v678_v55 = vld [vmem:[%s373_s10 + $0x8] sm:$0xff]  ;;  %v1341_v11 = vpop.eup %1096 }
  0x4b   : > { %555 = vmatpush.bf16.msra.mxu0 %v986_v0  ;;  %v680_v56 = vld [vmem:[%s373_s10 + $0x18] sm:$0xff]  ;;  %v730_v59 = vadd.f32 %v679_v51, %v677_v50  ;;  %v681_v63 = vld [vmem:[%s373_s10 + $0x20] sm:$0xff]  ;;  %v682_v2 = vld [vmem:[%s373_s10 + $0x28] sm:$0xff]  ;;  %v706_v20 = vmul.f32 24.0, %v1341_v11  ;;  %vm710_vm1 = vweird.f32 %v1341_v11 }
  0x4c   : > { %591 = vmatpush.bf16.msra.mxu2 %v990_v1  ;;  %633 = vperm.xlu0 %1093, %v624_v16   ;;  %v738_v0 = vadd.f32 %v680_v56, %v678_v55  ;;  %v748_v13 = vmax.f32 %v677_v50, %v681_v63  ;;  %v756_v14 = vmax.f32 %v678_v55, %v682_v2 }
  0x4d   : > { %v731_v5 = vadd.f32 %v730_v59, %v681_v63 }
  0x4e   : > { %662 = vperm.xlu2 %1095, %v649_v23   ;;  %v739_v10 = vadd.f32 %v738_v0, %v682_v2 }
  0x4f   : > { %556 = vmatpush.bf16.msra.mxu0 %v978_v6 }
  0x50   : > { %592 = vmatpush.bf16.msra.mxu2 %v982_v9  ;;  %v740_v22 = vrot.slane %v739_v10, 4 }
  0x53   : > { %557 = vmatpush.bf16.msra.mxu0 %v970_v17  ;;  %1034 = vmatmul.msk.bf16.gmra.mxu3 %vm544_vm0, %v451_v24  ;;  %v732_v17 = vrot.slane %v731_v5, 4 }
  0x54   : > { %593 = vmatpush.bf16.msra.mxu2 %v974_v18 }
  0x55   : > { %1032 = vmatmul.msk.bf16.gmra.mxu1 %vm544_vm0, %v451_v24  ;;  %v749_v24 = vmax.f32 %v748_v13, %v679_v51 }
  0x57   : > { %558 = vmatpush.bf16.msra.mxu0 %v962_v25  ;;  %v757_v25 = vmax.f32 %v756_v14, %v680_v56 }
  0x58   : > { %594 = vmatpush.bf16.msra.mxu2 %v966_v28  ;;  %v733_v28 = vadd.f32 %v732_v17, %v731_v5 }
  0x5a   : > { %559 = vmatmul.bf16.vlgmr.msra.gmra.mxu0 %v954_v29 }
  0x5b   : > { %595 = vmatmul.bf16.vlgmr.msra.gmra.mxu2 %v954_v29 }
  0x6a   : > { %564 = vmatmul.bf16.gmra.mxu0 %v450_v31 }
  0x6b   : > { %600 = vmatmul.bf16.gmra.mxu2 %v450_v31 }
  0xa0   : > { %v658_v53 = vpop.permute.xlu2 %657 }
  0xa8   : > { %v663_v19 = vpop.permute.xlu2 %662 }
  0xb4   : > { %v1334_v36 = vpop.permute.xlu1 %638 }
  0xb6   : > { %v629_v37 = vpop.permute.xlu0 %628 }
  0xbc   : > { %v653_v43 = vpop.permute.xlu1 %652 }
  0xbe   : > { %v634_v49 = vpop.permute.xlu0 %633 }
  0xc2   : > { %v578_v32 = vpop.f32.mrf.mxu1 }
  0xc6   : > { %v614_v33 = vpop.f32.mrf.mxu3 }
  0xca   : > { %v580_v34 = vpop.f32.mrf.mxu1 }
  0xce   : > { %v616_v35 = vpop.f32.mrf.mxu3 }
  0xd2   : > { %v583_v38 = vpop.f32.mrf.mxu1 }
  0xd6   : > { %v619_v41 = vpop.f32.mrf.mxu3 }
  0xd7   : > { %v560_v39 = vpop.f32.mrf.mxu0 }
  0xd8   : > { %v579_v40 = vadd.f32 %v578_v32, %v560_v39  ;;  %v758_v39 = vrot.slane %v757_v25, 4 }
  0xda   : > { %v641_v42 = vmul.f32 %v629_v37, %v579_v40  ;;  %v585_v44 = vpop.f32.mrf.mxu1 }
  0xdb   : > { %v734_v44 = vrot.slane %v733_v28, 2 }
  0xdc   : > { %v665_v48 = vadd.f32 %v653_v43, %v641_v42 }
  0xdd   : > { %v735_v55 = vadd.f32 %v734_v44, %v733_v28 }
  0xde   : > { %v596_v45 = vpop.f32.mrf.mxu2  ;;  %v621_v57 = vpop.f32.mrf.mxu3  ;;  %v671_v61 = vmax.f32 %v665_v48, 0.0 }
  0xdf   : > { %v615_v46 = vadd.f32 %v614_v33, %v596_v45  ;;  %v562_v47 = vpop.f32.mrf.mxu0  ;;  %v707_v33 = vsub.f32 1.0, %v706_v20 }
  0xe0   : > { %v581_v52 = vadd.f32 %v580_v34, %v562_v47 }
  0xe1   : > { %v642_v54 = vmul.f32 %v629_v37, %v615_v46  ;;  %v741_v37 = vadd.f32 %v740_v22, %v739_v10  ;;  %v708_v46 = vmul.f32 %v1341_v11, %v707_v33 }
  0xe2   : > { %v643_v58 = vmul.f32 %v634_v49, %v581_v52  ;;  %v759_v52 = vmax.f32 %v757_v25, %v758_v39 }
  0xe3   : > { %v666_v60 = vadd.f32 %v653_v43, %v642_v54  ;;  %v709_v59 = vadd.f32 %v1341_v11, %v708_v46 }
  0xe4   : > { %v667_v3 = vadd.f32 %v658_v53, %v643_v58 }
  0xe5   : > { %v1338_v1 = vmax.f32 %v666_v60, 0.0 }
  0xe6   : > { %v598_v4 = vpop.f32.mrf.mxu2  ;;  %v673_v15 = vmax.f32 %v667_v3, 0.0  ;;  %v760_v3 = vrot.slane %v759_v52, 2 }
  0xe7   : > { %v683_v6 = vpack.c.bf16 %v1338_v1, %v671_v61  ;;  %v617_v7 = vadd.f32 %v616_v35, %v598_v4  ;;  %v565_v8 = vpop.f32.mrf.mxu0 }
  0xe8   : > { %v584_v9 = vadd.f32 %v583_v38, %v565_v8  ;;  %v689_v27 = vadd.f32 %v673_v15, %v671_v61  ;;  %v750_v38 = vrot.slane %v749_v24, 4 }
  0xe9   : > { %686 = vst [vmem:[%s1343_s26] sm:$0xff] %v683_v6  ;;  %v644_v12 = vmul.f32 %v634_v49, %v617_v7  ;;  %v742_v49 = vrot.slane %v741_v37, 2  ;;  %v736_v6 = vrot.slane %v735_v55, 1 }
  0xea   : > { %v645_v16 = vmul.f32 %v1334_v36, %v584_v9  ;;  %v751_v50 = vmax.f32 %v749_v24, %v750_v38 }
  0xeb   : > { %v668_v18 = vadd.f32 %v658_v53, %v644_v12  ;;  %v743_v62 = vadd.f32 %v742_v49, %v741_v37  ;;  %v737_v17 = vadd.f32 %v736_v6, %v735_v55 }
  0xec   : > { %v669_v21 = vadd.f32 %v663_v19, %v645_v16  ;;  %v752_v63 = vrot.slane %v751_v50, 2  ;;  %v761_v16 = vmax.f32 %v759_v52, %v760_v3 }
  0xed   : > { %v674_v23 = vmax.f32 %v668_v18, 0.0  ;;  %v744_v12 = vrot.slane %v743_v62, 1 }
  0xee   : > { %v675_v26 = vmax.f32 %v669_v21, 0.0  ;;  %v601_v29 = vpop.f32.mrf.mxu2  ;;  %v753_v13 = vmax.f32 %v751_v50, %v752_v63 }
  0xef   : > { %v684_v30 = vpack.c.bf16 %v674_v23, %v673_v15  ;;  %v620_v31 = vadd.f32 %v619_v41, %v601_v29  ;;  %v567_v32 = vpop.f32.mrf.mxu0  ;;  %v697_v41 = vadd.f32 %v674_v23, %v1338_v1  ;;  %v745_v22 = vadd.f32 %v744_v12, %v743_v62 }
  0xf0   : > { %v690_v34 = vadd.f32 %v689_v27, %v675_v26  ;;  %v714_v35 = vmax.f32 %v671_v61, %v675_v26 }
  0xf1   : > { %687 = vst [vmem:[%s1343_s26 + $0x8] sm:$0xff] %v684_v30  ;;  %v646_v40 = vmul.f32 %v1334_v36, %v620_v31 }
  0xf2   : > { %v691_v42 = vrot.slane %v690_v34, 4  ;;  %v715_v43 = vmax.f32 %v714_v35, %v673_v15 }
  0xf3   : > { %v670_v45 = vadd.f32 %v663_v19, %v646_v40 }
  0xf4   : > { %v692_v47 = vadd.f32 %v691_v42, %v690_v34  ;;  %v716_v48 = vrot.slane %v715_v43, 4 }
  0xf5   : > { %v676_v51 = vmax.f32 %v670_v45, 0.0  ;;  %v828_v45 = vld [vmem:[%s1343_s26] sm:$0xff] (%p1194_p5) }
  0xf6   : > { %v693_v53 = vrot.slane %v692_v47, 2  ;;  %v717_v54 = vmax.f32 %v715_v43, %v716_v48  ;;  %v603_v56 = vpop.f32.mrf.mxu2  ;;  %829 = vst [vmem:[%s795_s20] sm:$0xff] (%p1194_p5), %v828_v45 }
  0xf7   : > { %v685_v36 = vpack.c.bf16 %v676_v51, %v675_v26  ;;  %v698_v57 = vadd.f32 %v697_v41, %v676_v51  ;;  %v722_v58 = vmax.f32 %v1338_v1, %v676_v51  ;;  %v711_v1 = vsel %vm710_vm1, %v1341_v11, %v709_v59 }
  0xf8   : > { %v694_v60 = vadd.f32 %v693_v53, %v692_v47  ;;  %v718_v61 = vrot.slane %v717_v54, 2  ;;  %v762_v11 = vrot.slane %v761_v16, 1  ;;  %v746_v26 = vmul.f32 %v737_v17, %v711_v1  ;;  %v830_v46 = vld [vmem:[%s1343_s26 + $0x8] sm:$0xff] (%p1194_p5) }
  0xf9   : > { %688 = vst [vmem:[%s1343_s26 + $0x10] sm:$0xff] %v685_v36  ;;  %v699_v0 = vrot.slane %v698_v57, 4  ;;  %v723_v2 = vmax.f32 %v722_v58, %v674_v23  ;;  %v754_v23 = vrot.slane %v753_v13, 1  ;;  %v747_v30 = vmul.f32 %v745_v22, %v711_v1 }
  0xfa   : > { %v695_v4 = vrot.slane %v694_v60, 1  ;;  %v719_v5 = vmax.f32 %v717_v54, %v718_v61  ;;  %v763_v34 = vmax.f32 %v761_v16, %v762_v11  ;;  %831 = vst [vmem:[%s795_s20 + $0x10] sm:$0xff] (%p1194_p5), %v830_v46 }
  0xfb   : > { %v700_v7 = vadd.f32 %v699_v0, %v698_v57  ;;  %v724_v8 = vrot.slane %v723_v2, 4  ;;  %v755_v31 = vmax.f32 %v753_v13, %v754_v23 }
  0xfc   : > { %v696_v9 = vadd.f32 %v695_v4, %v694_v60  ;;  %v720_v10 = vrot.slane %v719_v5, 1 }
  0xfd   : > { %v701_v14 = vrot.slane %v700_v7, 2  ;;  %v725_v15 = vmax.f32 %v723_v2, %v724_v8 }
  0xfe   : > { %v712_v18 = vmul.f32 %v711_v1, %v696_v9  ;;  %v721_v19 = vmax.f32 %v719_v5, %v720_v10 }
  0xff   : > { %v702_v20 = vadd.f32 %v701_v14, %v700_v7  ;;  %v726_v21 = vrot.slane %v725_v15, 2 }
 0x100   : > { %v765_v27 = vsel %vm764_vm2, %v712_v18, %v721_v19  ;;  %v832_v47 = vld [vmem:[%s1343_s26 + $0x10] sm:$0xff] (%p1194_p5) }
 0x101   : > { %v703_v24 = vrot.slane %v702_v20, 1  ;;  %v727_v25 = vmax.f32 %v725_v15, %v726_v21  ;;  %v768_v35 = vsel %vm767_vm3, %v765_v27, %v746_v26  ;;  %833 = vst [vmem:[%s795_s20 + $0x20] sm:$0xff] (%p1194_p5), %v832_v47 }
 0x102   : > { %v771_v39 = vsel %vm770_vm4, %v768_v35, %v755_v31 }
 0x103   : > { %v704_v28 = vadd.f32 %v703_v24, %v702_v20  ;;  %v728_v29 = vrot.slane %v727_v25, 1 }
 0x105   : > { %v713_v32 = vmul.f32 %v711_v1, %v704_v28  ;;  %v729_v33 = vmax.f32 %v727_v25, %v728_v29 }
 0x107   : > { %v766_v37 = vsel %vm764_vm2, %v713_v32, %v729_v33 }
 0x108   : > { %v769_v38 = vsel %vm767_vm3, %v766_v37, %v747_v30 }
 0x109   : > { %v772_v40 = vsel %vm770_vm4, %v769_v38, %v763_v34 }
 0x10a   : > { %v773_v42 = vpack.c.bf16 %v772_v40, %v771_v39 }
 0x10b   : > { %792 = sbr.rel (!%p1194_p5) target bundleno = 272 (0x110), region = 105 }
 0x10c   : > { %v775_v43 = vrot.slane %v773_v42, 2 }
 0x10e   : > { %v778_v44 = vsel %vm767_vm3, %v773_v42, %v775_v43 }
 0x10f   : > { %780 = vst [vmem:[%s415_s16] sm:$0xf] %v778_v44 }
 0x110 PF: > { %p14_p11 = scmp.ge.s32.totalorder %s1178_s25, 4   ;;  %s1396_s21 = smov %s1116_s22 }
 0x111   : > { %s1397_s22 = smov %s1188_s28  ;;  %s1398_s23 = smov %s1178_s25 }
 0x112   :  { %16 = sbr.rel (!%p14_p11) target bundleno = 2 (0x2), region = 194 }

// kernel: ppliteseg_forward.8
= control target key start
LH: loop header
LB: loop body
LE: loop exit
PB: predicated region body
PF: predicated region fallthrough
CT: control target
= control target key end

     0   :  { %s513_s15 = smov 0   ;;  %s515_s16 = smov 0   ;;  %s574_s0 = inlined_call_operand.vmem [shape: bf16[36,512], index: 0, kind: input, shape index: {}]   ;;  %s575_s1 = inlined_call_operand.vmem [shape: bf16[2,36], index: 1, kind: input, shape index: {}]   ;;  %s576_s2 = inlined_call_operand.vmem [shape: f32[2,1], index: 2, kind: input, shape index: {}]   ;;  %s577_s3 = inlined_call_operand.vmem [shape: f32[2,1], index: 3, kind: input, shape index: {}]   ;;  %s578_s4 = inlined_call_operand.vmem [shape: bf16[2,512], index: 4, kind: output, shape index: {}]  }
   0x1   :  { %s517_s17 = smov 0  }
   0x2 LB: > { %s402_s18 = sadd.s32 4294967295, %s485_s17   ;;  %s530_s19 = sadd.s32 1, %s485_s17   ;;  %s485_s17 = sphi %s517_s17, %s581_s17   ;;  %s481_s16 = sphi %s515_s16, %s580_s16   ;;  %s477_s15 = sphi %s513_s15, %s579_s15  }
   0x3   : > { %s18_s20 = ssub.s32 %s485_s17, %s530_s19  ;;  %s21_s21 = sadd.s32 1, %s481_s16 }
   0x4   : > { %p19_p0 = scmp.eq.s32.totalorder %s18_s20, 0  ;;  %p28_p1 = scmp.ne.s32.totalorder %s481_s16, %s477_s15 }
   0x5   : > { %p29_p2 = scmp.eq.s32.totalorder %s485_s17, 0  ;;  %p405_p4 = scmp.ge.s32.totalorder %s485_s17, 2 }
   0x6   : > { %s539_s22 = scalar_select %p19_p0, %s481_s16, %s21_s21  }
   0x7   : > { %p30_p3 = por %p29_p2, %p28_p1  ;;  %152 = sbr.rel (%p405_p4) target bundleno = 21 (0x15), region = 28 }
   0xc   : > { %155 = sbr.rel (!%p30_p3) target bundleno = 21 (0x15), region = 32  ;;  %s157_s23 = sand.u32 (%p30_p3), 1, %s481_s16  }
   0xd   : > { %s430_s24 = sshll.u32 (%p30_p3), %s485_s17, 3  ;;  %s435_s25 = smul.u32 (%p30_p3), 40, %s157_s23 }
   0xe   : > { %s162_s28 = scalar_lea.vmem (%p30_p3), %s574_s0, %s430_s24 }
   0xf   : > { %v199_v0 = vld [vmem:[%s162_s28] sm:$0xff] (%p30_p3)  ;;  %v201_v1 = vld [vmem:[%s162_s28 + $0x10] sm:$0xff] (%p30_p3)  ;;  %s159_s29 = scalar_lea.vmem (%p30_p3), [#allocation2], %s435_s25 }
  0x10   : > { %v203_v2 = vld [vmem:[%s162_s28 + $0x20] sm:$0xff] (%p30_p3)  ;;  %200 = vst [vmem:[%s159_s29] sm:$0xff] (%p30_p3), %v199_v0  ;;  %v205_v3 = vld [vmem:[%s162_s28 + $0x30] sm:$0xff] (%p30_p3) }
  0x11   : > { %202 = vst [vmem:[%s159_s29 + $0x8] sm:$0xff] %v201_v1  ;;  %v207_v4 = vld [vmem:[%s162_s28 + $0x40] sm:$0xff] }
  0x12   : > { %204 = vst [vmem:[%s159_s29 + $0x10] sm:$0xff] %v203_v2 }
  0x13   : > { %206 = vst [vmem:[%s159_s29 + $0x18] sm:$0xff] %v205_v3 }
  0x14   : > { %208 = vst [vmem:[%s159_s29 + $0x20] sm:$0xff] %v207_v4 }
  0x15 PF: > { %p408_p5 = scmp.ge.s32.totalorder %s485_s17, 1  ;;  %p213_p6 = scmp.lt.s32.totalorder %s485_s17, 3 }
  0x17   : > { %p214_p7 = pnand %p408_p5, %p213_p6 }
  0x18   : > { %s220_s30 = sand.u32 (!%p214_p7), 1, %s477_s15   ;;  %s409_s13 = sshll.u32 (!%p214_p7), %s402_s18, 1 }
  0x19   : > { %217 = sbr.rel (%p214_p7) target bundleno = 186 (0xba), region = 70  ;;  %p246_p8 = scmp.lt.s32.totalorder (!%p214_p7), %s409_s13, 3 }
  0x1a   : > { %s436_s7 = smul.u32 (!%p214_p7), 40, %s220_s30 }
  0x1c   : > { %s222_s8 = scalar_lea.vmem (!%p214_p7), [#allocation2], %s436_s7 }
  0x1e   : > { %v319_v5 = vld [vmem:[%s576_s2] sm:$0x3]  ;;  %v487_v6 = vmov 0   ;;  %vm286_vm0 = vcmask 1041408   ;;  %v420_v10 = vld [vmem:[%s222_s8 + $0x10] sm:$0xf] }
  0x1f   : > { %462 = vset.pattern.permute.xlu0 %v487_v6  ;;  %v256_v7 = vld [vmem:[%s222_s8 + $0x20] sm:$0x33]  ;;  %v434_v13 = vld [vmem:[%s222_s8 + $0x14] sm:$0xf0]  ;;  %v433_v14 = vld [vmem:[%s222_s8 + $0x14] sm:$0xf] }
  0x20   : > { %322 = vperm.xlu0 %462, %v319_v5   ;;  %v270_v8 = vunpack.c.l.b16 %v256_v7  ;;  %v271_v9 = vunpack.c.h.b16 %v256_v7  ;;  %v422_v15 = vld [vmem:[%s222_s8 + $0x18] sm:$0xf0]  ;;  %v327_v16 = vld [vmem:[%s577_s3] sm:$0x3]  ;;  %v421_v19 = vor.u32 %v434_v13, %v420_v10  ;;  %v432_v22 = vld [vmem:[%s222_s8 + $0x4] sm:$0xf0] }
  0x21   : > { %v425_v20 = vor.u32 %v433_v14, %v422_v15  ;;  %v412_v21 = vld [vmem:[%s222_s8] sm:$0xf]  ;;  %v431_v23 = vld [vmem:[%s222_s8 + $0x4] sm:$0xf]  ;;  %v414_v24 = vld [vmem:[%s222_s8 + $0x8] sm:$0xf0] }
  0x22   : > { %v276_v11 = vpack.c.b16 %v270_v8, %v270_v8  ;;  %v277_v12 = vpack.c.b16 %v271_v9, %v271_v9  ;;  %v413_v25 = vor.u32 %v432_v22, %v412_v21  ;;  %v417_v26 = vor.u32 %v431_v23, %v414_v24  ;;  %v251_v27 = vld [vmem:[%s575_s1] sm:$0x1]  ;;  %s583_s13 = smov (!%p246_p8, %s409_s13), 3 }
  0x23   : > { %vm282_vm1 = vcmask 293888   ;;  %vm340_vm2 = vcmask 1040384   ;;  %s248_s17 = scalar_lea.vmem %s578_s4, %s583_s13 }
  0x24   : > { %v288_v17 = vsel %vm286_vm0, %v276_v11, 0  ;;  %v291_v18 = vsel %vm286_vm0, %v277_v12, 0 }
  0x25   : > { %298 = vmatpush.bf16.msra.mxu0 %v288_v17  ;;  %311 = vmatpush.bf16.msra.mxu1 %v291_v18 }
  0x28   : > { %330 = vperm.xlu0 %462, %v327_v16  }
  0x29   : > { %299 = vmatpush.bf16.msra.mxu0 %v421_v19  ;;  %312 = vmatpush.bf16.msra.mxu1 %v425_v20 }
  0x2d   : > { %300 = vmatpush.bf16.msra.mxu0 %v413_v25  ;;  %313 = vmatpush.bf16.msra.mxu1 %v417_v26 }
  0x30   : > { %426 = vmatmul.msk.bf16.vlgmr.msra.gmra.mxu0 %vm282_vm1, %v251_v27  ;;  %427 = vmatmul.msk.bf16.vlgmr.msra.gmra.mxu1 %vm282_vm1, %v251_v27 }
  0x92   : > { %v323_v28 = vpop.permute.xlu0 %322 }
  0x9a   : > { %v331_v33 = vpop.permute.xlu0 %330 }
  0xad   : > { %v302_v29 = vpop.f32.mrf.mxu0  ;;  %v315_v30 = vpop.f32.mrf.mxu1 }
  0xae   : > { %v325_v31 = vmul.f32 %v323_v28, %v302_v29  ;;  %v326_v32 = vmul.f32 %v323_v28, %v315_v30 }
  0xb0   : > { %v333_v34 = vadd.f32 %v331_v33, %v325_v31  ;;  %v334_v35 = vadd.f32 %v331_v33, %v326_v32 }
  0xb2   : > { %v335_v36 = vmax.f32 %v333_v34, 0.0  ;;  %v336_v37 = vmax.f32 %v334_v35, 0.0 }
  0xb4   : > { %v337_v38 = vpack.c.bf16 %v336_v37, %v335_v36 }
  0xb5   : > { %v304_v39 = vpop.f32.mrf.mxu0  ;;  %v317_v40 = vpop.f32.mrf.mxu1 }
  0xb6   : > { %v339_v41 = vrot.slane %v337_v38, 3 }
  0xb8   : > { %v343_v42 = vsel %vm340_vm2, %v337_v38, %v339_v41 }
  0xb9   : > { %345 = vst [vmem:[%s248_s17] sm:$0x3] %v343_v42 }
  0xba PF: > { %p11_p9 = scmp.ge.s32.totalorder %s530_s19, 4   ;;  %s579_s15 = smov %s481_s16 }
  0xbb   : > { %s580_s16 = smov %s539_s22  ;;  %s581_s17 = smov %s530_s19 }
  0xbc   :  { %13 = sbr.rel (!%p11_p9) target bundleno = 2 (0x2), region = 109 }

// kernel: ppliteseg_forward.9
= control target key start
LH: loop header
LB: loop body
LE: loop exit
PB: predicated region body
PF: predicated region fallthrough
CT: control target
= control target key end

     0   :  { %s933_s0 = inlined_call_operand.vmem [shape: bf16[18,512], index: 0, kind: input, shape index: {}]   ;;  %s934_s1 = inlined_call_operand.vmem [shape: f32[18,1], index: 1, kind: input, shape index: {}]   ;;  %s935_s2 = inlined_call_operand.<no memory space> [shape: f32[1,1], index: 2, kind: input, shape index: {}]   ;;  %s936_s4 = inlined_call_operand.vmem [shape: bf16[24,512], index: 4, kind: input, shape index: {}]   ;;  %s937_s5 = inlined_call_operand.vmem [shape: f32[24,512], index: 5, kind: input, shape index: {}]   ;;  %s938_s6 = inlined_call_operand.vmem [shape: bf16[24,512], index: 6, kind: output, shape index: {}]   ;;  %s939_s3 = inlined_call_operand.<no memory space> [shape: f32[1,1], index: 3, kind: input, shape index: {}]  }
   0x1   :  { %v11_v0 = vstv %s935_s2  ;;  %v13_v1 = vstv %s939_s3 }
   0x2   :  { %12 = vst [vmem:[#allocation2] sm:$0x1] %v11_v0 }
   0x3   :  { %14 = vst [vmem:[#allocation3] sm:$0x1] %v13_v1 }
   0x4   :  { %s832_s25 = smov 0   ;;  %s834_s26 = smov 0  }
   0x5   :  { %s836_s27 = smov 0  }
   0x6 LB: > { %s704_s2 = sadd.s32 4294967295, %s788_s27   ;;  %s849_s3 = sadd.s32 1, %s788_s27   ;;  %s788_s27 = sphi %s836_s27, %s944_s27   ;;  %s784_s26 = sphi %s834_s26, %s943_s26   ;;  %s780_s25 = sphi %s832_s25, %s942_s25  }
   0x7   : > { %s24_s28 = ssub.s32 %s788_s27, %s849_s3  ;;  %s27_s29 = sadd.s32 1, %s784_s26 }
   0x8   : > { %p25_p0 = scmp.eq.s32.totalorder %s24_s28, 0  ;;  %p34_p1 = scmp.ne.s32.totalorder %s784_s26, %s780_s25 }
   0x9   : > { %p35_p2 = scmp.eq.s32.totalorder %s788_s27, 0  ;;  %p179_p3 = scmp.eq.s32.totalorder %s704_s2, 1 }
   0xa   : > { %s860_s30 = scalar_select %p25_p0, %s784_s26, %s27_s29  }
   0xb   : > { %p862_p4 = por %p35_p2, %p34_p1  ;;  %p866_p5 = por %p179_p3, %p34_p1 }
   0xc   : > { %p707_p6 = scmp.ge.s32.totalorder %s788_s27, 2 }
   0xe   : > { %210 = sbr.rel (%p707_p6) target bundleno = 43 (0x2b), region = 28 }
  0x13   : > { %213 = sbr.rel (!%p862_p4) target bundleno = 26 (0x1a), region = 32  ;;  %s215_s9 = sand.u32 (%p862_p4), 1, %s784_s26  }
  0x14   : > { %s721_s10 = sshll.u32 (%p862_p4), %s788_s27, 3  ;;  %s725_s11 = smul.u32 (%p862_p4), 24, %s215_s9 }
  0x15   : > { %s220_s14 = scalar_lea.vmem (%p862_p4), %s933_s0, %s721_s10 }
  0x16   : > { %v253_v2 = vld [vmem:[%s220_s14] sm:$0xff] (%p862_p4)  ;;  %v255_v3 = vld [vmem:[%s220_s14 + $0x10] sm:$0xff] (%p862_p4)  ;;  %s217_s15 = scalar_lea.vmem (%p862_p4), [#allocation4], %s725_s11 }
  0x17   : > { %v257_v4 = vld [vmem:[%s220_s14 + $0x20] sm:$0xff] (%p862_p4)  ;;  %254 = vst [vmem:[%s217_s15] sm:$0xff] (%p862_p4), %v253_v2 }
  0x18   : > { %256 = vst [vmem:[%s217_s15 + $0x8] sm:$0xff] %v255_v3 }
  0x19   : > { %258 = vst [vmem:[%s217_s15 + $0x10] sm:$0xff] %v257_v4 }
  0x1a PF: > { %264 = sbr.rel (!%p862_p4) target bundleno = 33 (0x21), region = 70  ;;  %s266_s16 = sand.u32 (%p862_p4), 1, %s784_s26  }
  0x1b   : > { %s722_s17 = sshll.u32 (%p862_p4), %s788_s27, 3  ;;  %s726_s18 = smul.u32 (%p862_p4), 24, %s266_s16 }
  0x1c   : > { %s271_s21 = scalar_lea.vmem (%p862_p4), %s936_s4, %s722_s17 }
  0x1d   : > { %v304_v5 = vld [vmem:[%s271_s21] sm:$0xff] (%p862_p4)  ;;  %v306_v6 = vld [vmem:[%s271_s21 + $0x10] sm:$0xff] (%p862_p4)  ;;  %s268_s22 = scalar_lea.vmem (%p862_p4), [#allocation5], %s726_s18 }
  0x1e   : > { %v308_v7 = vld [vmem:[%s271_s21 + $0x20] sm:$0xff] (%p862_p4)  ;;  %305 = vst [vmem:[%s268_s22] sm:$0xff] (%p862_p4), %v304_v5 }
  0x1f   : > { %307 = vst [vmem:[%s268_s22 + $0x8] sm:$0xff] %v306_v6 }
  0x20   : > { %309 = vst [vmem:[%s268_s22 + $0x10] sm:$0xff] %v308_v7 }
  0x21 PF: > { %315 = sbr.rel (!%p862_p4) target bundleno = 43 (0x2b), region = 108  ;;  %s317_s23 = sand.u32 (%p862_p4), 1, %s784_s26  }
  0x22   : > { %s723_s24 = sshll.u32 (%p862_p4), %s788_s27, 4  ;;  %s727_s28 = smul.u32 (%p862_p4), 48, %s317_s23 }
  0x23   : > { %s322_s10 = scalar_lea.vmem (%p862_p4), %s937_s5, %s723_s24 }
  0x24   : > { %v335_v8 = vld [vmem:[%s322_s10] sm:$0xff] (%p862_p4)  ;;  %v337_v9 = vld [vmem:[%s322_s10 + $0x8] sm:$0xff] (%p862_p4)  ;;  %s319_s11 = scalar_lea.vmem (%p862_p4), [#allocation6], %s727_s28 }
  0x25   : > { %v339_v10 = vld [vmem:[%s322_s10 + $0x20] sm:$0xff] (%p862_p4)  ;;  %336 = vst [vmem:[%s319_s11] sm:$0xff] (%p862_p4), %v335_v8  ;;  %v341_v11 = vld [vmem:[%s322_s10 + $0x28] sm:$0xff] (%p862_p4) }
  0x26   : > { %338 = vst [vmem:[%s319_s11 + $0x8] sm:$0xff] %v337_v9  ;;  %v343_v12 = vld [vmem:[%s322_s10 + $0x40] sm:$0xff]  ;;  %v345_v13 = vld [vmem:[%s322_s10 + $0x48] sm:$0xff] }
  0x27   : > { %340 = vst [vmem:[%s319_s11 + $0x10] sm:$0xff] %v339_v10 }
  0x28   : > { %342 = vst [vmem:[%s319_s11 + $0x18] sm:$0xff] %v341_v11 }
  0x29   : > { %344 = vst [vmem:[%s319_s11 + $0x20] sm:$0xff] %v343_v12 }
  0x2a   : > { %346 = vst [vmem:[%s319_s11 + $0x28] sm:$0xff] %v345_v13 }
  0x2b PF: > { %p714_p7 = scmp.ge.s32.totalorder %s788_s27, 1  ;;  %p351_p8 = scmp.lt.s32.totalorder %s788_s27, 3 }
  0x2d   : > { %p352_p9 = pnand %p714_p7, %p351_p8 }
  0x2e   : > { %s358_s17 = sand.u32 (!%p352_p9), 1, %s780_s25  }
  0x2f   : > { %355 = sbr.rel (%p352_p9) target bundleno = 247 (0xf7), region = 131 }
  0x30   : > { %s906_s18 = smul.u32 (!%p352_p9), 24, %s358_s17 }
  0x31   : > { %s911_s20 = smul.u32 (!%p352_p9), 48, %s358_s17 }
  0x32   : > { %s360_s19 = scalar_lea.vmem (!%p352_p9), [#allocation4], %s906_s18  ;;  %s367_s21 = scalar_lea.vmem (!%p352_p9), [#allocation5], %s906_s18 }
  0x33   : > { %s374_s25 = scalar_lea.vmem (!%p352_p9), [#allocation6], %s911_s20  ;;  %s407_s22 = scalar_lea.vmem (!%p352_p9), [#allocation7], %s906_s18 }
  0x34   : > { %v421_v14 = vld [vmem:[%s934_s1] sm:$0xff]  ;;  %v423_v15 = vld [vmem:[%s934_s1 + $0x10] sm:$0x3]  ;;  %v790_v16 = vmov 0   ;;  %v422_v18 = vld [vmem:[%s934_s1 + $0x8] sm:$0xff]  ;;  %vm446_vm0 = vcmask 1041408  }
  0x35   : > { %755 = vset.pattern.permute.xlu0 %v790_v16  ;;  %756 = vset.pattern.permute.xlu1 %v790_v16  ;;  %v473_v17 = vld [vmem:[#allocation3] sm:$0x1]  ;;  %v464_v19 = vld [vmem:[#allocation2] sm:$0x1]  ;;  %v414_v20 = vld [vmem:[%s360_s19 + $0x10] sm:$0x11] }
  0x36   : > { %426 = vperm.xlu0 %755, %v421_v14   ;;  %436 = vperm.xlu1 %756, %v423_v15   ;;  %v412_v22 = vld [vmem:[%s360_s19] sm:$0xff]  ;;  %v419_v23 = vunpack.c.l.bf16 %v414_v20  ;;  %v420_v24 = vunpack.c.h.bf16 %v414_v20  ;;  %v413_v25 = vld [vmem:[%s360_s19 + $0x8] sm:$0xff]  ;;  %v520_v11 = vld [vmem:[%s367_s21] sm:$0xff]  ;;  %s724_s23 = sshll.u32 (%p866_p5), %s704_s2, 3 }
  0x37   : > { %757 = vset.pattern.permute.xlu2 %v790_v16  ;;  %v415_v26 = vunpack.c.l.bf16 %v412_v22  ;;  %v416_v27 = vunpack.c.h.bf16 %v412_v22  ;;  %v417_v29 = vunpack.c.l.bf16 %v413_v25  ;;  %v418_v30 = vunpack.c.h.bf16 %v413_v25  ;;  %v521_v14 = vld [vmem:[%s367_s21 + $0x8] sm:$0xff]  ;;  %s570_s29 = scalar_lea.vmem (%p866_p5), %s938_s6, %s724_s23 }
  0x38   : > { %476 = vperm.xlu2 %757, %v473_v17   ;;  %v524_v22 = vunpack.c.h.bf16 %v520_v11 }
  0x3e   : > { %431 = vperm.xlu0 %755, %v422_v18   ;;  %467 = vperm.xlu1 %756, %v464_v19   ;;  %v522_v18 = vld [vmem:[%s367_s21 + $0x10] sm:$0xff] }
  0x92   : > { %v477_v53 = vpop.permute.xlu2 %476 }
  0x93   : > { %v479_v59 = vperm.slane %v477_v53, 0 }
  0xa8   : > { %v427_v21 = vpop.permute.xlu0 %426  ;;  %v437_v28 = vpop.permute.xlu1 %436 }
  0xa9   : > { %v443_v31 = vmul.f32 %v437_v28, %v419_v23  ;;  %v444_v32 = vmul.f32 %v437_v28, %v420_v24  ;;  %v439_v34 = vmul.f32 %v427_v21, %v415_v26  ;;  %v440_v35 = vmul.f32 %v427_v21, %v416_v27 }
  0xaa   : > { %v523_v21 = vunpack.c.l.bf16 %v520_v11  ;;  %v525_v24 = vunpack.c.l.bf16 %v521_v14  ;;  %v527_v27 = vunpack.c.l.bf16 %v522_v18 }
  0xab   : > { %v447_v38 = vsel %vm446_vm0, %v443_v31, 0.0  ;;  %v456_v39 = vsel %vm446_vm0, %v444_v32, 0.0 }
  0xb0   : > { %v432_v33 = vpop.permute.xlu0 %431  ;;  %v468_v52 = vpop.permute.xlu1 %467 }
  0xb1   : > { %v441_v36 = vmul.f32 %v432_v33, %v417_v29  ;;  %v442_v37 = vmul.f32 %v432_v33, %v418_v30  ;;  %v470_v58 = vperm.slane %v468_v52, 0  ;;  %v526_v30 = vunpack.c.h.bf16 %v521_v14 }
  0xb2   : > { %v528_v33 = vunpack.c.h.bf16 %v522_v18 }
  0xb3   : > { %v445_v40 = vadd.f32 %v441_v36, %v439_v34  ;;  %v455_v41 = vadd.f32 %v442_v37, %v440_v35  ;;  %v529_v34 = vld [vmem:[%s374_s25] sm:$0xff]  ;;  %v531_v35 = vld [vmem:[%s374_s25 + $0x10] sm:$0xff] }
  0xb4   : > { %v533_v36 = vld [vmem:[%s374_s25 + $0x20] sm:$0xff] }
  0xb5   : > { %v448_v42 = vadd.f32 %v447_v38, %v445_v40  ;;  %v457_v43 = vadd.f32 %v456_v39, %v455_v41  ;;  %v530_v38 = vld [vmem:[%s374_s25 + $0x8] sm:$0xff]  ;;  %v532_v39 = vld [vmem:[%s374_s25 + $0x18] sm:$0xff] }
  0xb6   : > { %v534_v40 = vld [vmem:[%s374_s25 + $0x28] sm:$0xff] }
  0xb7   : > { %v449_v44 = vrot.slane %v448_v42, 4  ;;  %v458_v45 = vrot.slane %v457_v43, 4 }
  0xb9   : > { %v450_v46 = vadd.f32 %v449_v44, %v448_v42  ;;  %v459_v47 = vadd.f32 %v458_v45, %v457_v43 }
  0xbb   : > { %v451_v48 = vrot.slane %v450_v46, 2  ;;  %v460_v49 = vrot.slane %v459_v47, 2 }
  0xbd   : > { %v452_v50 = vadd.f32 %v451_v48, %v450_v46  ;;  %v461_v51 = vadd.f32 %v460_v49, %v459_v47 }
  0xbf   : > { %v453_v54 = vrot.slane %v452_v50, 1  ;;  %v462_v55 = vrot.slane %v461_v51, 1 }
  0xc1   : > { %v454_v56 = vadd.f32 %v453_v54, %v452_v50  ;;  %v463_v57 = vadd.f32 %v462_v55, %v461_v51 }
  0xc3   : > { %v471_v60 = vmul.f32 %v470_v58, %v454_v56  ;;  %v472_v61 = vmul.f32 %v470_v58, %v463_v57 }
  0xc5   : > { %v480_v62 = vadd.f32 %v479_v59, %v471_v60  ;;  %v481_v63 = vadd.f32 %v479_v59, %v472_v61 }
  0xc7   : > { %v715_v0 = vmul.f32 -1.442695, %v480_v62  ;;  %v716_v1 = vmul.f32 -1.442695, %v481_v63 }
  0xc9   : > { %758 = vpow2.f32 %v715_v0 }
  0xca   : > { %760 = vpow2.f32 %v716_v1 }
  0xcf   : > { %v759_v2 = vpop.eup %758 }
  0xd0   : > { %v761_v3 = vpop.eup %760  ;;  %v488_v4 = vadd.f32 1.0, %v759_v2 }
  0xd1   : > { %v489_v5 = vadd.f32 1.0, %v761_v3 }
  0xd2   : > { %762 = vrcp.f32 %v488_v4  ;;  %v501_v12 = vand.u32 2147483648, %v488_v4  ;;  %v499_v16 = vand.u32 2147483647, %v488_v4  ;;  %vm495_vm3 = vweird.f32 %v488_v4 }
  0xd3   : > { %764 = vrcp.f32 %v489_v5  ;;  %v516_v17 = vand.u32 2147483648, %v489_v5  ;;  %v514_v20 = vand.u32 2147483647, %v489_v5  ;;  %vm510_vm5 = vweird.f32 %v489_v5 }
  0xd4   : > { %v502_v25 = vor.u32 1.1754944e-38, %v501_v12  ;;  %vm500_vm6 = vcmp.eq.f32.partialorder %v499_v16, 8.507059e+37 }
  0xd5   : > { %v517_v29 = vor.u32 1.1754944e-38, %v516_v17  ;;  %vm515_vm8 = vcmp.eq.f32.partialorder %v514_v20, 8.507059e+37 }
  0xd8   : > { %v763_v6 = vpop.eup %762 }
  0xd9   : > { %v765_v7 = vpop.eup %764  ;;  %v491_v8 = vmul.f32 %v763_v6, %v488_v4  ;;  %vm496_vm1 = vweird.f32 %v763_v6 }
  0xda   : > { %v506_v9 = vmul.f32 %v765_v7, %v489_v5  ;;  %vm511_vm2 = vweird.f32 %v765_v7  ;;  %vm497_vm4 = vmor %vm495_vm3, %vm496_vm1 }
  0xdb   : > { %v492_v10 = vsub.f32 1.0, %v491_v8  ;;  %vm512_vm7 = vmor %vm510_vm5, %vm511_vm2 }
  0xdc   : > { %v507_v13 = vsub.f32 1.0, %v506_v9 }
  0xdd   : > { %v493_v15 = vmul.f32 %v763_v6, %v492_v10 }
  0xde   : > { %v508_v19 = vmul.f32 %v765_v7, %v507_v13 }
  0xdf   : > { %v494_v23 = vadd.f32 %v763_v6, %v493_v15 }
  0xe0   : > { %v509_v26 = vadd.f32 %v765_v7, %v508_v19 }
  0xe1   : > { %v498_v28 = vsel %vm497_vm4, %v763_v6, %v494_v23 }
  0xe2   : > { %v503_v31 = vsel %vm500_vm6, %v502_v25, %v498_v28  ;;  %v513_v32 = vsel %vm512_vm7, %v765_v7, %v509_v26 }
  0xe3   : > { %v518_v37 = vsel %vm515_vm8, %v517_v29, %v513_v32  ;;  %v535_v41 = vmul.f32 %v523_v21, %v503_v31  ;;  %v541_v42 = vsub.f32 1.0, %v503_v31  ;;  %v537_v44 = vmul.f32 %v525_v24, %v503_v31 }
  0xe4   : > { %v536_v43 = vmul.f32 %v524_v22, %v518_v37  ;;  %v539_v45 = vmul.f32 %v527_v27, %v503_v31  ;;  %v542_v46 = vsub.f32 1.0, %v518_v37  ;;  %v538_v47 = vmul.f32 %v526_v30, %v518_v37 }
  0xe5   : > { %v543_v48 = vmul.f32 %v541_v42, %v529_v34  ;;  %v545_v49 = vmul.f32 %v541_v42, %v531_v35  ;;  %v547_v50 = vmul.f32 %v541_v42, %v533_v36  ;;  %v540_v51 = vmul.f32 %v528_v33, %v518_v37 }
  0xe6   : > { %v544_v52 = vmul.f32 %v542_v46, %v530_v38  ;;  %v546_v53 = vmul.f32 %v542_v46, %v532_v39  ;;  %v548_v54 = vmul.f32 %v542_v46, %v534_v40 }
  0xe7   : > { %v549_v55 = vadd.f32 %v543_v48, %v535_v41  ;;  %v551_v56 = vadd.f32 %v545_v49, %v537_v44  ;;  %v553_v57 = vadd.f32 %v547_v50, %v539_v45 }
  0xe8   : > { %v550_v58 = vadd.f32 %v544_v52, %v536_v43  ;;  %v552_v59 = vadd.f32 %v546_v53, %v538_v47  ;;  %v554_v60 = vadd.f32 %v548_v54, %v540_v51 }
  0xea   : > { %v555_v61 = vpack.c.bf16 %v550_v58, %v549_v55  ;;  %v556_v62 = vpack.c.bf16 %v552_v59, %v551_v56  ;;  %v557_v63 = vpack.c.bf16 %v554_v60, %v553_v57  ;;  %567 = sbr.rel (!%p866_p5) target bundleno = 247 (0xf7), region = 147 }
  0xec   : > { %558 = vst [vmem:[%s407_s22] sm:$0xff] %v555_v61 }
  0xed   : > { %559 = vst [vmem:[%s407_s22 + $0x8] sm:$0xff] %v556_v62 }
  0xee   : > { %560 = vst [vmem:[%s407_s22 + $0x10] sm:$0xff] %v557_v63 }
  0xf3   : > { %v603_v0 = vld [vmem:[%s407_s22] sm:$0xff] }
  0xf4   : > { %v605_v1 = vld [vmem:[%s407_s22 + $0x8] sm:$0xff]  ;;  %604 = vst [vmem:[%s570_s29] sm:$0xff] %v603_v0 }
  0xf5   : > { %v607_v2 = vld [vmem:[%s407_s22 + $0x10] sm:$0xff]  ;;  %606 = vst [vmem:[%s570_s29 + $0x10] sm:$0xff] %v605_v1 }
  0xf6   : > { %608 = vst [vmem:[%s570_s29 + $0x20] sm:$0xff] %v607_v2 }
  0xf7 PF: > { %p17_p10 = scmp.ge.s32.totalorder %s849_s3, 4   ;;  %s942_s25 = smov %s784_s26 }
  0xf8   : > { %s943_s26 = smov %s860_s30  ;;  %s944_s27 = smov %s849_s3 }
  0xf9   :  { %19 = sbr.rel (!%p17_p10) target bundleno = 6 (0x6), region = 232 }

// kernel: ppliteseg_forward.11
= control target key start
LH: loop header
LB: loop body
LE: loop exit
PB: predicated region body
PF: predicated region fallthrough
CT: control target
= control target key end

     0   :  { %s843_s18 = smov 0   ;;  %s845_s19 = smov 0   ;;  %s1004_s0 = inlined_call_operand.vmem [shape: bf16[144,512], index: 0, kind: input, shape index: {}]   ;;  %s1005_s1 = inlined_call_operand.vmem [shape: bf16[16,144], index: 1, kind: input, shape index: {}]   ;;  %s1006_s2 = inlined_call_operand.vmem [shape: f32[16,1], index: 2, kind: input, shape index: {}]   ;;  %s1007_s3 = inlined_call_operand.vmem [shape: f32[16,1], index: 3, kind: input, shape index: {}]   ;;  %s1008_s4 = inlined_call_operand.vmem [shape: bf16[5,16], index: 4, kind: input, shape index: {}]   ;;  %s1009_s5 = inlined_call_operand.vmem [shape: f32[5,512], index: 5, kind: output, shape index: {}]  }
   0x1   :  { %s847_s20 = smov 0  }
   0x2 LB: > { %s643_s21 = sadd.s32 4294967295, %s810_s20   ;;  %s860_s22 = sadd.s32 1, %s810_s20   ;;  %s810_s20 = sphi %s847_s20, %s1012_s20   ;;  %s806_s19 = sphi %s845_s19, %s1011_s19   ;;  %s802_s18 = sphi %s843_s18, %s1010_s18  }
   0x3   : > { %s19_s23 = ssub.s32 %s810_s20, %s860_s22  ;;  %s22_s24 = sadd.s32 1, %s806_s19 }
   0x4   : > { %p20_p0 = scmp.eq.s32.totalorder %s19_s23, 0  ;;  %p29_p1 = scmp.ne.s32.totalorder %s806_s19, %s802_s18 }
   0x5   : > { %p30_p2 = scmp.eq.s32.totalorder %s810_s20, 0  ;;  %p646_p4 = scmp.ge.s32.totalorder %s810_s20, 2 }
   0x6   : > { %s869_s25 = scalar_select %p20_p0, %s806_s19, %s22_s24  }
   0x7   : > { %p31_p3 = por %p30_p2, %p29_p1  ;;  %177 = sbr.rel (%p646_p4) target bundleno = 34 (0x22), region = 32 }
   0xc   : > { %180 = sbr.rel (!%p31_p3) target bundleno = 34 (0x22), region = 36  ;;  %s182_s26 = sand.u32 (%p31_p3), 1, %s806_s19  }
   0xd   : > { %s738_s27 = sshll.u32 (%p31_p3), %s810_s20, 3  ;;  %s759_s28 = smul.u32 (%p31_p3), 144, %s182_s26 }
   0xe   : > { %s877_s6 = scalar_lea.vmem (%p31_p3), %s1004_s0, %s738_s27 }
   0xf   : > { %v250_v0 = vld [vmem:[%s877_s6] sm:$0xff] (%p31_p3)  ;;  %v252_v1 = vld [vmem:[%s877_s6 + $0x10] sm:$0xff] (%p31_p3)  ;;  %s882_s7 = scalar_lea.vmem (%p31_p3), [#allocation2], %s759_s28 }
  0x10   : > { %v254_v2 = vld [vmem:[%s877_s6 + $0x20] sm:$0xff] (%p31_p3)  ;;  %251 = vst [vmem:[%s882_s7] sm:$0xff] (%p31_p3), %v250_v0  ;;  %v256_v3 = vld [vmem:[%s877_s6 + $0x30] sm:$0xff] (%p31_p3) }
  0x11   : > { %253 = vst [vmem:[%s882_s7 + $0x8] sm:$0xff] %v252_v1  ;;  %v258_v4 = vld [vmem:[%s877_s6 + $0x40] sm:$0xff]  ;;  %v260_v5 = vld [vmem:[%s877_s6 + $0x50] sm:$0xff] }
  0x12   : > { %255 = vst [vmem:[%s882_s7 + $0x10] sm:$0xff] %v254_v2  ;;  %v262_v6 = vld [vmem:[%s877_s6 + $0x60] sm:$0xff]  ;;  %v264_v7 = vld [vmem:[%s877_s6 + $0x70] sm:$0xff] }
  0x13   : > { %257 = vst [vmem:[%s882_s7 + $0x18] sm:$0xff] %v256_v3  ;;  %v266_v8 = vld [vmem:[%s877_s6 + $0x80] sm:$0xff]  ;;  %v268_v9 = vld [vmem:[%s877_s6 + $0x90] sm:$0xff] }
  0x14   : > { %259 = vst [vmem:[%s882_s7 + $0x20] sm:$0xff] %v258_v4  ;;  %v270_v10 = vld [vmem:[%s877_s6 + $0xa0] sm:$0xff]  ;;  %v272_v11 = vld [vmem:[%s877_s6 + $0xb0] sm:$0xff] }
  0x15   : > { %261 = vst [vmem:[%s882_s7 + $0x28] sm:$0xff] %v260_v5  ;;  %v274_v12 = vld [vmem:[%s877_s6 + $0xc0] sm:$0xff]  ;;  %v276_v13 = vld [vmem:[%s877_s6 + $0xd0] sm:$0xff] }
  0x16   : > { %263 = vst [vmem:[%s882_s7 + $0x30] sm:$0xff] %v262_v6  ;;  %v278_v14 = vld [vmem:[%s877_s6 + $0xe0] sm:$0xff]  ;;  %v280_v15 = vld [vmem:[%s877_s6 + $0xf0] sm:$0xff] }
  0x17   : > { %265 = vst [vmem:[%s882_s7 + $0x38] sm:$0xff] %v264_v7  ;;  %v282_v16 = vld [vmem:[%s877_s6 + $0x100] sm:$0xff]  ;;  %v284_v17 = vld [vmem:[%s877_s6 + $0x110] sm:$0xff] }
  0x18   : > { %267 = vst [vmem:[%s882_s7 + $0x40] sm:$0xff] %v266_v8 }
  0x19   : > { %269 = vst [vmem:[%s882_s7 + $0x48] sm:$0xff] %v268_v9 }
  0x1a   : > { %271 = vst [vmem:[%s882_s7 + $0x50] sm:$0xff] %v270_v10 }
  0x1b   : > { %273 = vst [vmem:[%s882_s7 + $0x58] sm:$0xff] %v272_v11 }
  0x1c   : > { %275 = vst [vmem:[%s882_s7 + $0x60] sm:$0xff] %v274_v12 }
  0x1d   : > { %277 = vst [vmem:[%s882_s7 + $0x68] sm:$0xff] %v276_v13 }
  0x1e   : > { %279 = vst [vmem:[%s882_s7 + $0x70] sm:$0xff] %v278_v14 }
  0x1f   : > { %281 = vst [vmem:[%s882_s7 + $0x78] sm:$0xff] %v280_v15 }
  0x20   : > { %283 = vst [vmem:[%s882_s7 + $0x80] sm:$0xff] %v282_v16 }
  0x21   : > { %285 = vst [vmem:[%s882_s7 + $0x88] sm:$0xff] %v284_v17 }
  0x22 PF: > { %p649_p5 = scmp.ge.s32.totalorder %s810_s20, 1  ;;  %p290_p6 = scmp.lt.s32.totalorder %s810_s20, 3 }
  0x24   : > { %p291_p7 = pnand %p649_p5, %p290_p6 }
  0x25   : > { %s297_s8 = sand.u32 (!%p291_p7), 1, %s802_s18  }
  0x26   : > { %294 = sbr.rel (%p291_p7) target bundleno = 371 (0x173), region = 74 }
  0x27   : > { %s760_s9 = smul.u32 (!%p291_p7), 144, %s297_s8 }
  0x29   : > { %s920_s10 = scalar_lea.vmem (!%p291_p7), [#allocation2], %s760_s9  ;;  %s650_s9 = sshll.u32 (!%p291_p7), %s643_s21, 1 }
  0x2a   : > { %p326_p8 = scmp.lt.s32.totalorder (!%p291_p7), %s650_s9, 3 }
  0x2b   : > { %v718_v18 = vld [vmem:[%s920_s10 + $0x70] sm:$0xf]  ;;  %v756_v19 = vld [vmem:[%s920_s10 + $0x74] sm:$0xf0]  ;;  %v755_v20 = vld [vmem:[%s920_s10 + $0x74] sm:$0xf] }
  0x2c   : > { %v719_v21 = vor.u32 %v756_v19, %v718_v18  ;;  %v720_v22 = vld [vmem:[%s920_s10 + $0x78] sm:$0xf0]  ;;  %v710_v23 = vld [vmem:[%s920_s10 + $0x60] sm:$0xf]  ;;  %v754_v24 = vld [vmem:[%s920_s10 + $0x64] sm:$0xf0] }
  0x2d   : > { %v723_v25 = vor.u32 %v755_v20, %v720_v22  ;;  %v753_v26 = vld [vmem:[%s920_s10 + $0x64] sm:$0xf]  ;;  %v712_v27 = vld [vmem:[%s920_s10 + $0x68] sm:$0xf0]  ;;  %v711_v28 = vor.u32 %v754_v24, %v710_v23  ;;  %v702_v30 = vld [vmem:[%s920_s10 + $0x50] sm:$0xf] }
  0x2e   : > { %455 = vmatpush.bf16.msra.mxu0 %v719_v21  ;;  %v715_v29 = vor.u32 %v753_v26, %v712_v27  ;;  %v752_v31 = vld [vmem:[%s920_s10 + $0x54] sm:$0xf0]  ;;  %v751_v32 = vld [vmem:[%s920_s10 + $0x54] sm:$0xf]  ;;  %v704_v33 = vld [vmem:[%s920_s10 + $0x58] sm:$0xf0] }
  0x2f   : > { %483 = vmatpush.bf16.msra.mxu2 %v723_v25  ;;  %v703_v34 = vor.u32 %v752_v31, %v702_v30  ;;  %v694_v35 = vld [vmem:[%s920_s10 + $0x40] sm:$0xf]  ;;  %v739_v36 = vld [vmem:[%s1005_s1 + $0x4] sm:$0xf]  ;;  %v656_v37 = vld [vmem:[%s1005_s1 + $0x8] sm:$0xf0]  ;;  %v707_v38 = vor.u32 %v751_v32, %v704_v33 }
  0x30   : > { %v750_v39 = vld [vmem:[%s920_s10 + $0x44] sm:$0xf0]  ;;  %v757_v40 = vld [vmem:[%s920_s10 + $0x84] sm:$0xf]  ;;  %v728_v41 = vld [vmem:[%s920_s10 + $0x88] sm:$0xf0]  ;;  %v659_v45 = vor.u32 %v739_v36, %v656_v37 }
  0x31   : > { %v749_v42 = vld [vmem:[%s920_s10 + $0x44] sm:$0xf]  ;;  %v696_v43 = vld [vmem:[%s920_s10 + $0x48] sm:$0xf0]  ;;  %v731_v44 = vor.u32 %v757_v40, %v728_v41  ;;  %v726_v46 = vld [vmem:[%s920_s10 + $0x80] sm:$0xf]  ;;  %v695_v47 = vor.u32 %v750_v39, %v694_v35 }
  0x32   : > { %456 = vmatpush.bf16.msra.mxu0 %v711_v28  ;;  %vm451_vm0 = vcmask 130048   ;;  %v758_v48 = vld [vmem:[%s920_s10 + $0x84] sm:$0xf0]  ;;  %v699_v49 = vor.u32 %v749_v42, %v696_v43  ;;  %v686_v50 = vld [vmem:[%s920_s10 + $0x30] sm:$0xf]  ;;  %v812_v56 = vmov 0  }
  0x33   : > { %484 = vmatpush.bf16.msra.mxu2 %v715_v29  ;;  %504 = vmatpush.bf16.msra.mxu3 %v731_v44  ;;  %v748_v51 = vld [vmem:[%s920_s10 + $0x34] sm:$0xf0]  ;;  %v727_v52 = vor.u32 %v758_v48, %v726_v46  ;;  %v511_v53 = vld [vmem:[%s1006_s2] sm:$0xff]  ;;  %v688_v55 = vld [vmem:[%s920_s10 + $0x38] sm:$0xf0]  ;;  %s1014_s9 = smov (!%p326_p8, %s650_s9), 3 }
  0x34   : > { %v747_v54 = vld [vmem:[%s920_s10 + $0x34] sm:$0xf]  ;;  %786 = vset.pattern.permute.xlu0 %v812_v56  ;;  %787 = vset.pattern.permute.xlu1 %v812_v56  ;;  %v687_v58 = vor.u32 %v748_v51, %v686_v50  ;;  %v678_v60 = vld [vmem:[%s920_s10 + $0x20] sm:$0xf]  ;;  %v746_v61 = vld [vmem:[%s920_s10 + $0x24] sm:$0xf0] }
  0x35   : > { %v527_v57 = vld [vmem:[%s1007_s3] sm:$0xff]  ;;  %476 = vmatpush.bf16.msra.mxu1 %v727_v52  ;;  %515 = vperm.xlu0 %786, %v511_v53   ;;  %v691_v59 = vor.u32 %v747_v54, %v688_v55  ;;  %v680_v63 = vld [vmem:[%s920_s10 + $0x28] sm:$0xf0]  ;;  %v679_v0 = vor.u32 %v746_v61, %v678_v60  ;;  %v744_v3 = vld [vmem:[%s920_s10 + $0x14] sm:$0xf0] }
  0x36   : > { %457 = vmatpush.bf16.msra.mxu0 %v703_v34  ;;  %733 = vmatmul.msk.bf16.vlgmr.msra.gmra.mxu3 %vm451_vm0, %v659_v45  ;;  %v745_v62 = vld [vmem:[%s920_s10 + $0x24] sm:$0xf]  ;;  %v670_v2 = vld [vmem:[%s920_s10 + $0x10] sm:$0xf]  ;;  %v512_v4 = vld [vmem:[%s1006_s2 + $0x8] sm:$0xff] }
  0x37   : > { %485 = vmatpush.bf16.msra.mxu2 %v707_v38  ;;  %531 = vperm.xlu1 %787, %v527_v57   ;;  %v683_v1 = vor.u32 %v745_v62, %v680_v63  ;;  %v743_v5 = vld [vmem:[%s920_s10 + $0x14] sm:$0xf]  ;;  %v672_v6 = vld [vmem:[%s920_s10 + $0x18] sm:$0xf0]  ;;  %v671_v8 = vor.u32 %v744_v3, %v670_v2  ;;  %v662_v10 = vld [vmem:[%s920_s10] sm:$0xf] }
  0x38   : > { %732 = vmatmul.msk.bf16.vlgmr.msra.gmra.mxu1 %vm451_vm0, %v659_v45  ;;  %v528_v7 = vld [vmem:[%s1007_s3 + $0x8] sm:$0xff]  ;;  %v675_v9 = vor.u32 %v743_v5, %v672_v6  ;;  %v741_v12 = vld [vmem:[%s920_s10 + $0x4] sm:$0xf]  ;;  %v654_v15 = vld [vmem:[%s1005_s1] sm:$0xf] }
  0x39   : > { %v742_v11 = vld [vmem:[%s920_s10 + $0x4] sm:$0xf0]  ;;  %v664_v13 = vld [vmem:[%s920_s10 + $0x8] sm:$0xf0]  ;;  %v547_v45 = vld [vmem:[%s1008_s4] sm:$0x7] }
  0x3a   : > { %458 = vmatpush.bf16.msra.mxu0 %v695_v47  ;;  %v663_v14 = vor.u32 %v742_v11, %v662_v10  ;;  %v740_v16 = vld [vmem:[%s1005_s1 + $0x4] sm:$0xf0]  ;;  %v667_v17 = vor.u32 %v741_v12, %v664_v13  ;;  %s651_s10 = sshll.u32 %s1014_s9, 3 }
  0x3b   : > { %486 = vmatpush.bf16.msra.mxu2 %v699_v49  ;;  %v655_v18 = vor.u32 %v740_v16, %v654_v15  ;;  %s329_s13 = scalar_lea.vmem %s1009_s5, %s651_s10 }
  0x3d   : > { %520 = vperm.xlu0 %786, %v512_v4  }
  0x3e   : > { %459 = vmatpush.bf16.msra.mxu0 %v687_v58 }
  0x3f   : > { %487 = vmatpush.bf16.msra.mxu2 %v691_v59  ;;  %536 = vperm.xlu1 %787, %v528_v7  }
  0x42   : > { %460 = vmatpush.bf16.msra.mxu0 %v679_v0 }
  0x43   : > { %488 = vmatpush.bf16.msra.mxu2 %v683_v1 }
  0x46   : > { %461 = vmatpush.bf16.msra.mxu0 %v671_v8 }
  0x47   : > { %489 = vmatpush.bf16.msra.mxu2 %v675_v9 }
  0x4a   : > { %462 = vmatpush.bf16.msra.mxu0 %v663_v14 }
  0x4b   : > { %490 = vmatpush.bf16.msra.mxu2 %v667_v17 }
  0x4d   : > { %463 = vmatmul.bf16.vlgmr.msra.gmra.mxu0 %v655_v18 }
  0x4e   : > { %491 = vmatmul.bf16.vlgmr.msra.gmra.mxu2 %v655_v18 }
  0xa7   : > { %v516_v20 = vpop.permute.xlu0 %515 }
  0xa9   : > { %v532_v22 = vpop.permute.xlu1 %531 }
  0xaf   : > { %v521_v31 = vpop.permute.xlu0 %520 }
  0xb1   : > { %v537_v34 = vpop.permute.xlu1 %536 }
  0xb5   : > { %v478_v19 = vpop.f32.mrf.mxu1 }
  0xb9   : > { %v506_v24 = vpop.f32.mrf.mxu3 }
  0xbd   : > { %v480_v25 = vpop.f32.mrf.mxu1 }
  0xc1   : > { %v508_v38 = vpop.f32.mrf.mxu3 }
  0xca   : > { %v464_v21 = vpop.f32.mrf.mxu0 }
  0xcb   : > { %v479_v23 = vadd.f32 %v478_v19, %v464_v21 }
  0xcd   : > { %v523_v26 = vmul.f32 %v516_v20, %v479_v23 }
  0xcf   : > { %v539_v32 = vadd.f32 %v532_v22, %v523_v26 }
  0xd1   : > { %v492_v27 = vpop.f32.mrf.mxu2  ;;  %v543_v37 = vmax.f32 %v539_v32, 0.0 }
  0xd2   : > { %v466_v28 = vpop.f32.mrf.mxu0  ;;  %v507_v30 = vadd.f32 %v506_v24, %v492_v27 }
  0xd3   : > { %v481_v29 = vadd.f32 %v480_v25, %v466_v28 }
  0xd4   : > { %v524_v36 = vmul.f32 %v516_v20, %v507_v30 }
  0xd5   : > { %v525_v33 = vmul.f32 %v521_v31, %v481_v29 }
  0xd6   : > { %v540_v44 = vadd.f32 %v532_v22, %v524_v36 }
  0xd7   : > { %v541_v35 = vadd.f32 %v537_v34, %v525_v33 }
  0xd8   : > { %v544_v47 = vmax.f32 %v540_v44, 0.0 }
  0xd9   : > { %v545_v39 = vmax.f32 %v541_v35, 0.0  ;;  %v494_v40 = vpop.f32.mrf.mxu2 }
  0xda   : > { %v509_v41 = vadd.f32 %v508_v38, %v494_v40 }
  0xdb   : > { %v548_v42 = vpack.c.bf16 %v545_v39, %v543_v37 }
  0xdc   : > { %v526_v43 = vmul.f32 %v521_v31, %v509_v41 }
  0xdd   : > { %560 = vmatpush.bf16.msrb.mxu1 %v548_v42 }
  0xde   : > { %v542_v46 = vadd.f32 %v537_v34, %v526_v43 }
  0xe0   : > { %v546_v48 = vmax.f32 %v542_v46, 0.0  ;;  %734 = vmatmul.msk.bf16.vlgmr.msrb.gmra.mxu1 %vm451_vm0, %v547_v45 }
  0xe2   : > { %v549_v49 = vpack.c.bf16 %v546_v48, %v544_v47 }
  0xe4   : > { %573 = vmatpush.bf16.msrb.mxu3 %v549_v49 }
  0xe7   : > { %735 = vmatmul.msk.bf16.vlgmr.msrb.gmra.mxu3 %vm451_vm0, %v547_v45 }
 0x15d   : > { %v562_v50 = vpop.f32.mrf.mxu1 }
 0x15e   : > { %579 = vst [vmem:[%s329_s13] sm:$0x1f] %v562_v50 }
 0x165   : > { %v564_v51 = vpop.f32.mrf.mxu1 }
 0x16a   : > { %v575_v52 = vpop.f32.mrf.mxu3 }
 0x16b   : > { %580 = vst [vmem:[%s329_s13 + $0x8] sm:$0x1f] %v575_v52 }
 0x172   : > { %v577_v53 = vpop.f32.mrf.mxu3 }
 0x173 PF: > { %p12_p9 = scmp.ge.s32.totalorder %s860_s22, 4   ;;  %s1010_s18 = smov %s806_s19 }
 0x174   : > { %s1011_s19 = smov %s869_s25  ;;  %s1012_s20 = smov %s860_s22 }
 0x175   :  { %14 = sbr.rel (!%p12_p9) target bundleno = 2 (0x2), region = 113 }

// kernel: ppliteseg_forward.10
= control target key start
LH: loop header
LB: loop body
LE: loop exit
PB: predicated region body
PF: predicated region fallthrough
CT: control target
= control target key end

     0   :  { %s954_s15 = smov 0   ;;  %s956_s16 = smov 0   ;;  %s1155_s0 = inlined_call_operand.vmem [shape: bf16[216,512], index: 0, kind: input, shape index: {}]   ;;  %s1156_s1 = inlined_call_operand.vmem [shape: bf16[16,216], index: 1, kind: input, shape index: {}]   ;;  %s1157_s2 = inlined_call_operand.vmem [shape: f32[16,1], index: 2, kind: input, shape index: {}]   ;;  %s1158_s3 = inlined_call_operand.vmem [shape: f32[16,1], index: 3, kind: input, shape index: {}]   ;;  %s1159_s4 = inlined_call_operand.vmem [shape: bf16[16,512], index: 4, kind: output, shape index: {}]  }
   0x1   :  { %s958_s17 = smov 0  }
   0x2 LB: > { %s718_s18 = sadd.s32 4294967295, %s926_s17   ;;  %s971_s19 = sadd.s32 1, %s926_s17   ;;  %s926_s17 = sphi %s958_s17, %s1163_s17   ;;  %s922_s16 = sphi %s956_s16, %s1162_s16   ;;  %s918_s15 = sphi %s954_s15, %s1161_s15  }
   0x3   : > { %s18_s20 = ssub.s32 %s926_s17, %s971_s19  ;;  %s21_s21 = sadd.s32 1, %s922_s16 }
   0x4   : > { %p19_p0 = scmp.eq.s32.totalorder %s18_s20, 0  ;;  %p28_p1 = scmp.ne.s32.totalorder %s922_s16, %s918_s15 }
   0x5   : > { %p29_p2 = scmp.eq.s32.totalorder %s926_s17, 0  ;;  %p121_p3 = scmp.eq.s32.totalorder %s718_s18, 1 }
   0x6   : > { %s982_s22 = scalar_select %p19_p0, %s922_s16, %s21_s21  }
   0x7   : > { %p30_p4 = por %p29_p2, %p28_p1  ;;  %p984_p5 = por %p121_p3, %p28_p1 }
   0x8   : > { %p721_p6 = scmp.ge.s32.totalorder %s926_s17, 2 }
   0xa   : > { %152 = sbr.rel (%p721_p6) target bundleno = 46 (0x2e), region = 28 }
   0xf   : > { %155 = sbr.rel (!%p30_p4) target bundleno = 46 (0x2e), region = 32  ;;  %s157_s24 = sand.u32 (%p30_p4), 1, %s922_s16  }
  0x10   : > { %s845_s25 = sshll.u32 (%p30_p4), %s926_s17, 3  ;;  %s875_s26 = smul.u32 (%p30_p4), 216, %s157_s24 }
  0x11   : > { %s994_s29 = scalar_lea.vmem (%p30_p4), %s1155_s0, %s845_s25 }
  0x12   : > { %v243_v0 = vld [vmem:[%s994_s29] sm:$0xff] (%p30_p4)  ;;  %v245_v1 = vld [vmem:[%s994_s29 + $0x10] sm:$0xff] (%p30_p4)  ;;  %s999_s30 = scalar_lea.vmem (%p30_p4), [#allocation2], %s875_s26 }
  0x13   : > { %v247_v2 = vld [vmem:[%s994_s29 + $0x20] sm:$0xff] (%p30_p4)  ;;  %244 = vst [vmem:[%s999_s30] sm:$0xff] (%p30_p4), %v243_v0  ;;  %v249_v3 = vld [vmem:[%s994_s29 + $0x30] sm:$0xff] (%p30_p4) }
  0x14   : > { %246 = vst [vmem:[%s999_s30 + $0x8] sm:$0xff] %v245_v1  ;;  %v251_v4 = vld [vmem:[%s994_s29 + $0x40] sm:$0xff]  ;;  %v253_v5 = vld [vmem:[%s994_s29 + $0x50] sm:$0xff] }
  0x15   : > { %248 = vst [vmem:[%s999_s30 + $0x10] sm:$0xff] %v247_v2  ;;  %v255_v6 = vld [vmem:[%s994_s29 + $0x60] sm:$0xff]  ;;  %v257_v7 = vld [vmem:[%s994_s29 + $0x70] sm:$0xff] }
  0x16   : > { %250 = vst [vmem:[%s999_s30 + $0x18] sm:$0xff] %v249_v3  ;;  %v259_v8 = vld [vmem:[%s994_s29 + $0x80] sm:$0xff]  ;;  %v261_v9 = vld [vmem:[%s994_s29 + $0x90] sm:$0xff] }
  0x17   : > { %252 = vst [vmem:[%s999_s30 + $0x20] sm:$0xff] %v251_v4  ;;  %v263_v10 = vld [vmem:[%s994_s29 + $0xa0] sm:$0xff]  ;;  %v265_v11 = vld [vmem:[%s994_s29 + $0xb0] sm:$0xff] }
  0x18   : > { %254 = vst [vmem:[%s999_s30 + $0x28] sm:$0xff] %v253_v5  ;;  %v267_v12 = vld [vmem:[%s994_s29 + $0xc0] sm:$0xff]  ;;  %v269_v13 = vld [vmem:[%s994_s29 + $0xd0] sm:$0xff] }
  0x19   : > { %256 = vst [vmem:[%s999_s30 + $0x30] sm:$0xff] %v255_v6  ;;  %v271_v14 = vld [vmem:[%s994_s29 + $0xe0] sm:$0xff]  ;;  %v273_v15 = vld [vmem:[%s994_s29 + $0xf0] sm:$0xff] }
  0x1a   : > { %258 = vst [vmem:[%s999_s30 + $0x38] sm:$0xff] %v257_v7  ;;  %v275_v16 = vld [vmem:[%s994_s29 + $0x100] sm:$0xff]  ;;  %v277_v17 = vld [vmem:[%s994_s29 + $0x110] sm:$0xff] }
  0x1b   : > { %260 = vst [vmem:[%s999_s30 + $0x40] sm:$0xff] %v259_v8  ;;  %v279_v18 = vld [vmem:[%s994_s29 + $0x120] sm:$0xff]  ;;  %v281_v19 = vld [vmem:[%s994_s29 + $0x130] sm:$0xff] }
  0x1c   : > { %262 = vst [vmem:[%s999_s30 + $0x48] sm:$0xff] %v261_v9  ;;  %v283_v20 = vld [vmem:[%s994_s29 + $0x140] sm:$0xff]  ;;  %v285_v21 = vld [vmem:[%s994_s29 + $0x150] sm:$0xff] }
  0x1d   : > { %264 = vst [vmem:[%s999_s30 + $0x50] sm:$0xff] %v263_v10  ;;  %v287_v22 = vld [vmem:[%s994_s29 + $0x160] sm:$0xff]  ;;  %v289_v23 = vld [vmem:[%s994_s29 + $0x170] sm:$0xff] }
  0x1e   : > { %266 = vst [vmem:[%s999_s30 + $0x58] sm:$0xff] %v265_v11  ;;  %v291_v24 = vld [vmem:[%s994_s29 + $0x180] sm:$0xff]  ;;  %v293_v25 = vld [vmem:[%s994_s29 + $0x190] sm:$0xff] }
  0x1f   : > { %268 = vst [vmem:[%s999_s30 + $0x60] sm:$0xff] %v267_v12  ;;  %v295_v26 = vld [vmem:[%s994_s29 + $0x1a0] sm:$0xff] }
  0x20   : > { %270 = vst [vmem:[%s999_s30 + $0x68] sm:$0xff] %v269_v13 }
  0x21   : > { %272 = vst [vmem:[%s999_s30 + $0x70] sm:$0xff] %v271_v14 }
  0x22   : > { %274 = vst [vmem:[%s999_s30 + $0x78] sm:$0xff] %v273_v15 }
  0x23   : > { %276 = vst [vmem:[%s999_s30 + $0x80] sm:$0xff] %v275_v16 }
  0x24   : > { %278 = vst [vmem:[%s999_s30 + $0x88] sm:$0xff] %v277_v17 }
  0x25   : > { %280 = vst [vmem:[%s999_s30 + $0x90] sm:$0xff] %v279_v18 }
  0x26   : > { %282 = vst [vmem:[%s999_s30 + $0x98] sm:$0xff] %v281_v19 }
  0x27   : > { %284 = vst [vmem:[%s999_s30 + $0xa0] sm:$0xff] %v283_v20 }
  0x28   : > { %286 = vst [vmem:[%s999_s30 + $0xa8] sm:$0xff] %v285_v21 }
  0x29   : > { %288 = vst [vmem:[%s999_s30 + $0xb0] sm:$0xff] %v287_v22 }
  0x2a   : > { %290 = vst [vmem:[%s999_s30 + $0xb8] sm:$0xff] %v289_v23 }
  0x2b   : > { %292 = vst [vmem:[%s999_s30 + $0xc0] sm:$0xff] %v291_v24 }
  0x2c   : > { %294 = vst [vmem:[%s999_s30 + $0xc8] sm:$0xff] %v293_v25 }
  0x2d   : > { %296 = vst [vmem:[%s999_s30 + $0xd0] sm:$0xff] %v295_v26 }
  0x2e PF: > { %p724_p7 = scmp.ge.s32.totalorder %s926_s17, 1  ;;  %p301_p8 = scmp.lt.s32.totalorder %s926_s17, 3 }
  0x30   : > { %p302_p9 = pnand %p724_p7, %p301_p8 }
  0x31   : > { %s308_s5 = sand.u32 (!%p302_p9), 1, %s918_s15  }
  0x32   : > { %305 = sbr.rel (%p302_p9) target bundleno = 249 (0xf9), region = 70 }
  0x33   : > { %s876_s6 = smul.u32 (!%p302_p9), 216, %s308_s5 }
  0x35   : > { %s1057_s7 = scalar_lea.vmem (!%p302_p9), [#allocation2], %s876_s6  ;;  %s725_s6 = sshll.u32 (!%p302_p9), %s308_s5, 4 }
  0x37   : > { %v792_v27 = vld [vmem:[%s1057_s7 + $0x70] sm:$0xf]  ;;  %v863_v28 = vld [vmem:[%s1057_s7 + $0x74] sm:$0xf0]  ;;  %v862_v29 = vld [vmem:[%s1057_s7 + $0x74] sm:$0xf] }
  0x38   : > { %v793_v30 = vor.u32 %v863_v28, %v792_v27  ;;  %v794_v31 = vld [vmem:[%s1057_s7 + $0x78] sm:$0xf0]  ;;  %v363_v32 = vld [vmem:[%s1057_s7 + $0xd0] sm:$0xff]  ;;  %v784_v33 = vld [vmem:[%s1057_s7 + $0x60] sm:$0xf]  ;;  %vm512_vm0 = vcmask 1043456  }
  0x39   : > { %v797_v34 = vor.u32 %v862_v29, %v794_v31  ;;  %v453_v35 = vunpack.c.h.b16 %v363_v32  ;;  %v861_v36 = vld [vmem:[%s1057_s7 + $0x64] sm:$0xf0]  ;;  %v860_v37 = vld [vmem:[%s1057_s7 + $0x64] sm:$0xf]  ;;  %v786_v38 = vld [vmem:[%s1057_s7 + $0x68] sm:$0xf0]  ;;  %v452_v39 = vunpack.c.l.b16 %v363_v32 }
  0x3a   : > { %519 = vmatpush.bf16.msra.mxu0 %v793_v30  ;;  %v785_v40 = vor.u32 %v861_v36, %v784_v33  ;;  %v872_v41 = vld [vmem:[%s1057_s7 + $0xc4] sm:$0xf]  ;;  %v834_v42 = vld [vmem:[%s1057_s7 + $0xc8] sm:$0xf0]  ;;  %v789_v44 = vor.u32 %v860_v37, %v786_v38  ;;  %v776_v46 = vld [vmem:[%s1057_s7 + $0x50] sm:$0xf] }
  0x3b   : > { %547 = vmatpush.bf16.msra.mxu2 %v797_v34  ;;  %v481_v43 = vpack.c.b16 %v453_v35, %v453_v35  ;;  %v480_v45 = vpack.c.b16 %v452_v39, %v452_v39  ;;  %v859_v47 = vld [vmem:[%s1057_s7 + $0x54] sm:$0xf0]  ;;  %v858_v48 = vld [vmem:[%s1057_s7 + $0x54] sm:$0xf]  ;;  %v778_v49 = vld [vmem:[%s1057_s7 + $0x58] sm:$0xf0]  ;;  %v837_v54 = vor.u32 %v872_v41, %v834_v42 }
  0x3c   : > { %v832_v50 = vld [vmem:[%s1057_s7 + $0xc0] sm:$0xf]  ;;  %v873_v51 = vld [vmem:[%s1057_s7 + $0xc4] sm:$0xf0]  ;;  %v777_v55 = vor.u32 %v859_v47, %v776_v46  ;;  %v870_v56 = vld [vmem:[%s1057_s7 + $0xb4] sm:$0xf]  ;;  %v781_v58 = vor.u32 %v858_v48, %v778_v49 }
  0x3d   : > { %v517_v52 = vsel %vm512_vm0, %v481_v43, 0  ;;  %v514_v53 = vsel %vm512_vm0, %v480_v45, 0  ;;  %v826_v57 = vld [vmem:[%s1057_s7 + $0xb8] sm:$0xf0]  ;;  %v833_v59 = vor.u32 %v873_v51, %v832_v50  ;;  %v768_v60 = vld [vmem:[%s1057_s7 + $0x40] sm:$0xf] }
  0x3e   : > { %563 = vmatpush.bf16.msra.mxu3 %v517_v52  ;;  %520 = vmatpush.bf16.msra.mxu0 %v785_v40  ;;  %v857_v61 = vld [vmem:[%s1057_s7 + $0x44] sm:$0xf0]  ;;  %v856_v62 = vld [vmem:[%s1057_s7 + $0x44] sm:$0xf]  ;;  %v770_v63 = vld [vmem:[%s1057_s7 + $0x48] sm:$0xf0]  ;;  %v829_v2 = vor.u32 %v870_v56, %v826_v57 }
  0x3f   : > { %548 = vmatpush.bf16.msra.mxu2 %v789_v44  ;;  %535 = vmatpush.bf16.msra.mxu1 %v514_v53  ;;  %v824_v0 = vld [vmem:[%s1057_s7 + $0xb0] sm:$0xf]  ;;  %v871_v1 = vld [vmem:[%s1057_s7 + $0xb4] sm:$0xf0]  ;;  %v769_v3 = vor.u32 %v857_v61, %v768_v60  ;;  %v868_v4 = vld [vmem:[%s1057_s7 + $0xa4] sm:$0xf]  ;;  %v773_v6 = vor.u32 %v856_v62, %v770_v63 }
  0x40   : > { %v818_v5 = vld [vmem:[%s1057_s7 + $0xa8] sm:$0xf0]  ;;  %v825_v7 = vor.u32 %v871_v1, %v824_v0  ;;  %v760_v8 = vld [vmem:[%s1057_s7 + $0x30] sm:$0xf]  ;;  %v855_v9 = vld [vmem:[%s1057_s7 + $0x34] sm:$0xf0] }
  0x41   : > { %v854_v10 = vld [vmem:[%s1057_s7 + $0x34] sm:$0xf]  ;;  %v762_v11 = vld [vmem:[%s1057_s7 + $0x38] sm:$0xf0]  ;;  %v816_v12 = vld [vmem:[%s1057_s7 + $0xa0] sm:$0xf]  ;;  %v821_v14 = vor.u32 %v868_v4, %v818_v5  ;;  %v761_v15 = vor.u32 %v855_v9, %v760_v8 }
  0x42   : > { %564 = vmatpush.bf16.msra.mxu3 %v837_v54  ;;  %521 = vmatpush.bf16.msra.mxu0 %v777_v55  ;;  %v869_v13 = vld [vmem:[%s1057_s7 + $0xa4] sm:$0xf0]  ;;  %v866_v16 = vld [vmem:[%s1057_s7 + $0x94] sm:$0xf]  ;;  %v810_v17 = vld [vmem:[%s1057_s7 + $0x98] sm:$0xf0]  ;;  %v765_v18 = vor.u32 %v854_v10, %v762_v11 }
  0x43   : > { %549 = vmatpush.bf16.msra.mxu2 %v781_v58  ;;  %536 = vmatpush.bf16.msra.mxu1 %v833_v59  ;;  %v817_v19 = vor.u32 %v869_v13, %v816_v12  ;;  %v752_v20 = vld [vmem:[%s1057_s7 + $0x20] sm:$0xf]  ;;  %v853_v21 = vld [vmem:[%s1057_s7 + $0x24] sm:$0xf0]  ;;  %v852_v22 = vld [vmem:[%s1057_s7 + $0x24] sm:$0xf]  ;;  %v813_v27 = vor.u32 %v866_v16, %v810_v17 }
  0x44   : > { %v754_v23 = vld [vmem:[%s1057_s7 + $0x28] sm:$0xf0]  ;;  %v808_v24 = vld [vmem:[%s1057_s7 + $0x90] sm:$0xf]  ;;  %v867_v25 = vld [vmem:[%s1057_s7 + $0x94] sm:$0xf0]  ;;  %v753_v28 = vor.u32 %v853_v21, %v752_v20 }
  0x45   : > { %v864_v26 = vld [vmem:[%s1057_s7 + $0x84] sm:$0xf]  ;;  %v802_v29 = vld [vmem:[%s1057_s7 + $0x88] sm:$0xf0]  ;;  %v757_v32 = vor.u32 %v852_v22, %v754_v23  ;;  %v809_v33 = vor.u32 %v867_v25, %v808_v24  ;;  %v744_v34 = vld [vmem:[%s1057_s7 + $0x10] sm:$0xf] }
  0x46   : > { %565 = vmatpush.bf16.msra.mxu3 %v829_v2  ;;  %522 = vmatpush.bf16.msra.mxu0 %v769_v3  ;;  %v575_v30 = vld [vmem:[%s1157_s2] sm:$0xff]  ;;  %v851_v35 = vld [vmem:[%s1057_s7 + $0x14] sm:$0xf0]  ;;  %v850_v36 = vld [vmem:[%s1057_s7 + $0x14] sm:$0xf]  ;;  %v928_v40 = vmov 0   ;;  %v805_v41 = vor.u32 %v864_v26, %v802_v29 }
  0x47   : > { %550 = vmatpush.bf16.msra.mxu2 %v773_v6  ;;  %537 = vmatpush.bf16.msra.mxu1 %v825_v7  ;;  %v591_v31 = vld [vmem:[%s1158_s3] sm:$0xff]  ;;  %v746_v37 = vld [vmem:[%s1057_s7 + $0x18] sm:$0xf0]  ;;  %v745_v42 = vor.u32 %v851_v35, %v744_v34  ;;  %v730_v44 = vld [vmem:[%s1156_s1 + $0x8] sm:$0xf0]  ;;  %vm508_vm1 = vcmask 719872  }
  0x48   : > { %v800_v38 = vld [vmem:[%s1057_s7 + $0x80] sm:$0xf]  ;;  %v865_v39 = vld [vmem:[%s1057_s7 + $0x84] sm:$0xf0]  ;;  %902 = vset.pattern.permute.xlu0 %v928_v40  ;;  %903 = vset.pattern.permute.xlu1 %v928_v40  ;;  %v846_v43 = vld [vmem:[%s1156_s1 + $0x4] sm:$0xf]  ;;  %v749_v45 = vor.u32 %v850_v36, %v746_v37 }
  0x49   : > { %579 = vperm.xlu0 %902, %v575_v30   ;;  %595 = vperm.xlu1 %903, %v591_v31   ;;  %v801_v46 = vor.u32 %v865_v39, %v800_v38  ;;  %v736_v47 = vld [vmem:[%s1057_s7] sm:$0xf]  ;;  %v849_v48 = vld [vmem:[%s1057_s7 + $0x4] sm:$0xf0]  ;;  %v848_v49 = vld [vmem:[%s1057_s7 + $0x4] sm:$0xf]  ;;  %v733_v51 = vor.u32 %v846_v43, %v730_v44 }
  0x4a   : > { %566 = vmatpush.bf16.msra.mxu3 %v821_v14  ;;  %523 = vmatpush.bf16.msra.mxu0 %v761_v15  ;;  %v738_v50 = vld [vmem:[%s1057_s7 + $0x8] sm:$0xf0]  ;;  %v737_v52 = vor.u32 %v849_v48, %v736_v47  ;;  %v728_v53 = vld [vmem:[%s1156_s1] sm:$0xf]  ;;  %v847_v54 = vld [vmem:[%s1156_s1 + $0x4] sm:$0xf0] }
  0x4b   : > { %551 = vmatpush.bf16.msra.mxu2 %v765_v18  ;;  %538 = vmatpush.bf16.msra.mxu1 %v817_v19  ;;  %v576_v55 = vld [vmem:[%s1157_s2 + $0x8] sm:$0xff]  ;;  %v741_v56 = vor.u32 %v848_v49, %v738_v50  ;;  %v729_v58 = vor.u32 %v847_v54, %v728_v53  ;;  %s331_s7 = scalar_lea.vmem [#allocation3], %s725_s6  ;;  %s874_s15 = sshll.u32 (%p984_p5), %s718_s18, 3 }
  0x4c   : > { %v592_v57 = vld [vmem:[%s1158_s3 + $0x8] sm:$0xff]  ;;  %s624_s9 = scalar_lea.vmem (%p984_p5), %s1159_s4, %s874_s15 }
  0x4e   : > { %567 = vmatpush.bf16.msra.mxu3 %v813_v27  ;;  %524 = vmatpush.bf16.msra.mxu0 %v753_v28 }
  0x4f   : > { %552 = vmatpush.bf16.msra.mxu2 %v757_v32  ;;  %539 = vmatpush.bf16.msra.mxu1 %v809_v33 }
  0x51   : > { %584 = vperm.xlu0 %902, %v576_v55   ;;  %600 = vperm.xlu1 %903, %v592_v57  }
  0x52   : > { %568 = vmatpush.bf16.msra.mxu3 %v805_v41  ;;  %525 = vmatpush.bf16.msra.mxu0 %v745_v42 }
  0x53   : > { %553 = vmatpush.bf16.msra.mxu2 %v749_v45  ;;  %540 = vmatpush.bf16.msra.mxu1 %v801_v46 }
  0x55   : > { %839 = vmatmul.msk.bf16.vlgmr.msra.gmra.mxu3 %vm508_vm1, %v733_v51 }
  0x56   : > { %526 = vmatpush.bf16.msra.mxu0 %v737_v52  ;;  %838 = vmatmul.msk.bf16.vlgmr.msra.gmra.mxu1 %vm508_vm1, %v733_v51 }
  0x57   : > { %554 = vmatpush.bf16.msra.mxu2 %v741_v56 }
  0x59   : > { %527 = vmatmul.bf16.vlgmr.msra.gmra.mxu0 %v729_v58 }
  0x5a   : > { %555 = vmatmul.bf16.vlgmr.msra.gmra.mxu2 %v729_v58 }
  0xbb   : > { %v580_v62 = vpop.permute.xlu0 %579  ;;  %v596_v1 = vpop.permute.xlu1 %595 }
  0xc3   : > { %v585_v11 = vpop.permute.xlu0 %584  ;;  %v601_v18 = vpop.permute.xlu1 %600 }
  0xd3   : > { %v542_v59 = vpop.f32.mrf.mxu1 }
  0xd6   : > { %v528_v60 = vpop.f32.mrf.mxu0 }
  0xd7   : > { %v543_v61 = vadd.f32 %v542_v59, %v528_v60 }
  0xd8   : > { %v570_v0 = vpop.f32.mrf.mxu3 }
  0xd9   : > { %v587_v63 = vmul.f32 %v580_v62, %v543_v61 }
  0xdb   : > { %v603_v3 = vadd.f32 %v596_v1, %v587_v63  ;;  %v544_v6 = vpop.f32.mrf.mxu1 }
  0xdd   : > { %v556_v2 = vpop.f32.mrf.mxu2  ;;  %v607_v9 = vmax.f32 %v603_v3, 0.0 }
  0xde   : > { %v571_v4 = vadd.f32 %v570_v0, %v556_v2  ;;  %v530_v5 = vpop.f32.mrf.mxu0 }
  0xdf   : > { %v545_v8 = vadd.f32 %v544_v6, %v530_v5 }
  0xe0   : > { %v588_v7 = vmul.f32 %v580_v62, %v571_v4  ;;  %v572_v14 = vpop.f32.mrf.mxu3 }
  0xe1   : > { %v589_v13 = vmul.f32 %v585_v11, %v545_v8 }
  0xe2   : > { %v604_v10 = vadd.f32 %v596_v1, %v588_v7 }
  0xe3   : > { %v605_v19 = vadd.f32 %v601_v18, %v589_v13 }
  0xe4   : > { %v608_v12 = vmax.f32 %v604_v10, 0.0 }
  0xe5   : > { %v558_v15 = vpop.f32.mrf.mxu2  ;;  %v609_v22 = vmax.f32 %v605_v19, 0.0 }
  0xe6   : > { %v611_v16 = vpack.c.bf16 %v608_v12, %v607_v9  ;;  %v573_v17 = vadd.f32 %v572_v14, %v558_v15 }
  0xe8   : > { %613 = vst [vmem:[%s331_s7] sm:$0xff] %v611_v16  ;;  %v590_v20 = vmul.f32 %v585_v11, %v573_v17 }
  0xea   : > { %v606_v21 = vadd.f32 %v601_v18, %v590_v20 }
  0xec   : > { %v610_v23 = vmax.f32 %v606_v21, 0.0  ;;  %621 = sbr.rel (!%p984_p5) target bundleno = 249 (0xf9), region = 78 }
  0xee   : > { %v612_v24 = vpack.c.bf16 %v610_v23, %v609_v22 }
  0xef   : > { %v655_v25 = vld [vmem:[%s331_s7] sm:$0xff] (%p984_p5) }
  0xf0   : > { %614 = vst [vmem:[%s331_s7 + $0x8] sm:$0xff] %v612_v24 }
  0xf1   : > { %656 = vst [vmem:[%s624_s9] sm:$0xff] %v655_v25 }
  0xf7   : > { %v657_v26 = vld [vmem:[%s331_s7 + $0x8] sm:$0xff] }
  0xf8   : > { %658 = vst [vmem:[%s624_s9 + $0x10] sm:$0xff] %v657_v26 }
  0xf9 PF: > { %p11_p10 = scmp.ge.s32.totalorder %s971_s19, 4   ;;  %s1161_s15 = smov %s922_s16 }
  0xfa   : > { %s1162_s16 = smov %s982_s22  ;;  %s1163_s17 = smov %s971_s19 }
  0xfb   :  { %13 = sbr.rel (!%p11_p10) target bundleno = 2 (0x2), region = 147 }

</bundles_post_ra>
